<compile_context>
chip_gen: v7x
topology: tpu7x:2x2x1
jax: 0.10.0
libtpu: 0.0.40
codegen_flags: <defaults>
</compile_context>

<pallas_src>
import numpy as np
import jax
import jax.numpy as jnp
from jax.experimental import pallas as pl
from jax.experimental.pallas import tpu as pltpu  # noqa: F401  (TPU backend assumed)

PAD_ID = 0

# --- small config consistent with the module ---------------------------------
B = 2            # batch
S = 8            # max_len
E = 32           # embedding_size (d_model)
H = 2            # num_heads
DK = E // H      # d_k = d_v
D_INNER = 64     # dense_size (FFN inner dim)
N_LAYERS = 2     # t_num_layers
N_CLASSES = 4
VOCAB = 16
EPS = 1e-5       # nn.LayerNorm default eps
NEG_INF = -1e9   # additive key-pad / off-block mask value

GS = H * B * S   # 32: rows/cols of the batched block-diagonal score matrix
assert GS == E   # packing assumption: score bias shares the 32-lane consts slab

# consts slab row layout (f32, lane width = E = 32)
_ROW_BIAS = 0                        # [ 0,32): (GS,GS) additive score bias
_ROW_NPAD = GS                       # [32,48): (B*S,E) non-pad multiply mask
_ROW_VEC = GS + B * S                # [48,60): per-layer [bo,ln1g,ln1b,b2,ln2g,ln2b]
_ROW_BF = _ROW_VEC + 6 * N_LAYERS    # 60     : classifier bias (padded to E lanes)
_CONST_ROWS = 64

# wmid slab row layout (bf16, lane width = E)
_WMID_PER_LAYER = 2 * DK + D_INNER   # wo_h0(16) + wo_h1(16) + w2(64) = 96
_WF_ROW = N_LAYERS * _WMID_PER_LAYER  # 192 : classifier weight (E,E), cols>=4 zero


# ------------------------------------------------------------------------------
# ONE fused Pallas kernel: both encoder layers + max-pool + classifier.
# Gridless; all operands live whole in VMEM (total footprint << 1 MiB).
# ------------------------------------------------------------------------------
def fused_transformer_kernel(x_ref, consts_ref, bqkv_ref, b1_ref,
                             wqkv_ref, wmid_ref, w1_ref,
                             logits_ref, attn_ref):
    x = x_ref[...]                               # (B*S, E)  f32 activations
    consts = consts_ref[...]                     # (64, E)   f32 masks + vectors
    wmid = wmid_ref[...]                         # (224, E)  bf16 [wo|wo|w2]*L + wf

    score_bias = consts[_ROW_BIAS:_ROW_BIAS + GS, :]        # (32, 32)
    npad = consts[_ROW_NPAD:_ROW_NPAD + B * S, :]           # (16, 32)

    attn_slabs = []
    for l in range(N_LAYERS):                    # static unroll over layers
        residual = x
        x_bf = x.astype(jnp.bfloat16)            # cast once, reused by 6 matmuls

        def proj(j):
            # head-major stacking: rows (h*B + b)*S + s ; sublane concat only.
            parts = [jnp.dot(x_bf, wqkv_ref[l * 6 + j * 2 + h],
                             preferred_element_type=jnp.float32)
                     + bqkv_ref[l * 6 + j * 2 + h]
                     for h in range(H)]
            return jnp.concatenate(parts, axis=0)            # (GS, DK) f32

        q32, k32, v32 = proj(0), proj(1), proj(2)

        # ONE scores matmul for all (batch, head) pairs; block-diag + key-pad
        # structure comes from the precomputed additive bias. 1/sqrt(d_k) is
        # already folded into Wq / bq.
        scores = jax.lax.dot_general(
            q32, k32, (((1,), (1,)), ((), ())),
            preferred_element_type=jnp.float32) + score_bias             # (32, 32)
        scores = scores - jnp.max(scores, axis=-1, keepdims=True)
        e = jnp.exp(scores)
        attn = e / jnp.sum(e, axis=-1, keepdims=True)        # exact softmax
        attn_slabs.append(attn)

        ctx = jnp.dot(attn, v32, preferred_element_type=jnp.float32)     # (32, DK)

        # output projection: sum over heads of ctx_h @ Wo[h*DK:(h+1)*DK, :]
        base = l * _WMID_PER_LAYER
        wo_h0 = wmid[base:base + DK]                          # (16, E) bf16
        wo_h1 = wmid[base + DK:base + 2 * DK]
        v0 = _ROW_VEC + l * 6
        bo = consts[v0 + 0:v0 + 1, :]
        attn_out = (jnp.dot(ctx[0:B * S].astype(jnp.bfloat16), wo_h0,
                            preferred_element_type=jnp.float32)
                    + jnp.dot(ctx[B * S:2 * B * S].astype(jnp.bfloat16), wo_h1,
                              preferred_element_type=jnp.float32)
                    + bo)

        # residual + LayerNorm1 + non-pad mask
        y = attn_out + residual
        mean1 = jnp.mean(y, axis=-1, keepdims=True)
        var1 = jnp.mean((y - mean1) ** 2, axis=-1, keepdims=True)
        y = ((y - mean1) * jax.lax.rsqrt(var1 + EPS)
             * consts[v0 + 1:v0 + 2, :] + consts[v0 + 2:v0 + 3, :])
        y = y * npad

        # position-wise FFN (Conv1d k=1 == per-position linear) + residual + LN2
        residual2 = y
        h1 = jnp.maximum(
            jnp.dot(y.astype(jnp.bfloat16), w1_ref[l],
                    preferred_element_type=jnp.float32) + b1_ref[l], 0.0)
        w2 = wmid[base + 2 * DK:base + _WMID_PER_LAYER]       # (64, E) bf16
        ff = (jnp.dot(h1.astype(jnp.bfloat16), w2,
                      preferred_element_type=jnp.float32)
              + consts[v0 + 3:v0 + 4, :])
        z = ff + residual2
        mean2 = jnp.mean(z, axis=-1, keepdims=True)
        var2 = jnp.mean((z - mean2) ** 2, axis=-1, keepdims=True)
        z = ((z - mean2) * jax.lax.rsqrt(var2 + EPS)
             * consts[v0 + 4:v0 + 5, :] + consts[v0 + 5:v0 + 6, :])
        x = z * npad

    # 'transformer_maxpool': max over the sequence (pad rows were zeroed, as in
    # torch), then classify.  Logits padded to 32 lanes (wrapper slices to 4).
    pooled = jnp.concatenate(
        [jnp.max(x[b * S:(b + 1) * S, :], axis=0, keepdims=True) for b in range(B)],
        axis=0)                                               # (B, E)
    wf = wmid[_WF_ROW:_WF_ROW + E]                            # (E, E) bf16
    bf = consts[_ROW_BF:_ROW_BF + 1, :]
    logits_ref[...] = (jnp.dot(pooled.astype(jnp.bfloat16), wf,
                               preferred_element_type=jnp.float32) + bf)
    # single lane-dense store of all attention probabilities
    attn_ref[...] = jnp.concatenate(attn_slabs, axis=1)       # (GS, L*GS)


def fused_forward(x_flat, consts, params):
    return pl.pallas_call(
        fused_transformer_kernel,
        out_shape=(
            jax.ShapeDtypeStruct((B, E), jnp.float32),                # padded logits
            jax.ShapeDtypeStruct((GS, N_LAYERS * GS), jnp.float32),   # attn slab
        ),
    )(x_flat, consts, params['bqkv'], params['b1'],
      params['wqkv'], params['wmid'], params['w1'])


# ------------------------------------------------------------------------------
# Glue: embeddings, mask construction, packed parameter construction.
# ------------------------------------------------------------------------------
def get_sinusoid_encoding_table(n_position, d_hid, padid=None):
    position = np.arange(n_position, dtype=np.float64)[:, None]
    div = np.power(10000.0, 2 * (np.arange(d_hid) // 2) / d_hid)
    table = position / div
    table[:, 0::2] = np.sin(table[:, 0::2])
    table[:, 1::2] = np.cos(table[:, 1::2])
    if padid is not None:
        table[padid] = 0.0
    return jnp.asarray(table, dtype=jnp.float32)


def init_params(key):
    keys = jax.random.split(key, 2 + N_LAYERS)
    params = {
        'embedding': 0.1 * jax.random.normal(keys[0], (VOCAB, E), jnp.float32),
        'pos_embedding': get_sinusoid_encoding_table(S + 1, E, padid=PAD_ID),
    }
    wf = 0.1 * jax.random.normal(keys[1], (E, N_CLASSES), jnp.float32)
    bf = jnp.zeros((N_CLASSES,), jnp.float32)

    scale = 1.0 / np.sqrt(DK)          # folded into the Q projection (W and b)
    wqkv, bqkv, wmid_rows, w1s, b1s, vec_rows = [], [], [], [], [], []
    for l in range(N_LAYERS):
        lk = jax.random.split(keys[2 + l], 6)
        wq = scale * 0.1 * jax.random.normal(lk[0], (E, H * DK), jnp.float32)
        wk = 0.1 * jax.random.normal(lk[1], (E, H * DK), jnp.float32)
        wv = 0.1 * jax.random.normal(lk[2], (E, H * DK), jnp.float32)
        bq = scale * jnp.zeros((H * DK,), jnp.float32)
        bk = jnp.zeros((H * DK,), jnp.float32)
        bv = jnp.zeros((H * DK,), jnp.float32)
        for w, b in ((wq, bq), (wk, bk), (wv, bv)):           # j = 0(q), 1(k), 2(v)
            for h in range(H):
                wqkv.append(w[:, h * DK:(h + 1) * DK])        # (E, DK)
                bqkv.append(b[None, h * DK:(h + 1) * DK])     # (1, DK)
        wo = 0.1 * jax.random.normal(lk[3], (E, E), jnp.float32)
        w2 = 0.1 * jax.random.normal(lk[5], (D_INNER, E), jnp.float32)
        wmid_rows += [wo[0:DK, :], wo[DK:2 * DK, :], w2]      # (16,E),(16,E),(64,E)
        w1s.append(0.1 * jax.random.normal(lk[4], (E, D_INNER), jnp.float32))
        b1s.append(jnp.zeros((1, D_INNER), jnp.float32))
        # rows: [bo, ln1_gamma, ln1_beta, b2, ln2_gamma, ln2_beta]
        vec_rows += [jnp.zeros((E,), jnp.float32), jnp.ones((E,), jnp.float32),
                     jnp.zeros((E,), jnp.float32), jnp.zeros((E,), jnp.float32),
                     jnp.ones((E,), jnp.float32), jnp.zeros((E,), jnp.float32)]
    wmid_rows.append(jnp.pad(wf, ((0, 0), (0, E - N_CLASSES))))        # (E, E)

    n_pad_rows = _CONST_ROWS - _ROW_BF - 1
    params['wqkv'] = jnp.stack(wqkv).astype(jnp.bfloat16)              # (L*3*H, E, DK)
    params['bqkv'] = jnp.stack(bqkv)                                   # (L*3*H, 1, DK)
    params['wmid'] = jnp.concatenate(wmid_rows, axis=0).astype(jnp.bfloat16)  # (224, E)
    params['w1'] = jnp.stack(w1s).astype(jnp.bfloat16)                 # (L, E, D_INNER)
    params['b1'] = jnp.stack(b1s)                                      # (L, 1, D_INNER)
    params['vec_slab'] = jnp.concatenate(
        [jnp.stack(vec_rows, axis=0),                                  # (6L, E)
         jnp.pad(bf, (0, E - N_CLASSES))[None, :],                     # (1, E)
         jnp.zeros((n_pad_rows, E), jnp.float32)], axis=0)             # -> (16, E)
    return params


def transformer_cm_forward(params, inputs, inputs_pos):
    # embedding + frozen sinusoid positional embedding; dropout = identity (eval)
    embedded = params['embedding'][inputs] + params['pos_embedding'][inputs_pos]  # (B,S,E)
    x_flat = embedded.reshape(B * S, E).astype(jnp.float32)

    # block-diagonal (per (head,batch) group) + key-pad additive score bias,
    # and the non-pad multiply mask; built once, shared by both layers.
    pad_tok = (inputs != PAD_ID)                               # (B, S) bool
    gidx = jnp.arange(GS) // S                                 # group id per row/col
    block_ok = gidx[:, None] == gidx[None, :]                  # (32, 32)
    key_ok = jnp.tile(pad_tok.reshape(-1), (H,))               # (32,) j=(h*B+b)*S+s
    score_bias = jnp.where(block_ok & key_ok[None, :], 0.0, NEG_INF).astype(jnp.float32)
    npad_bc = jnp.broadcast_to(pad_tok.astype(jnp.float32).reshape(B * S, 1),
                               (B * S, E))
    consts = jnp.concatenate([score_bias, npad_bc, params['vec_slab']], axis=0)  # (64,E)

    logits_pad, attn_slab = fused_forward(x_flat, consts, params)
    logits = logits_pad[:, :N_CLASSES]

    # extract the per-(head,batch) diagonal (S,S) blocks, head-major ordering
    gi = jnp.arange(H * B)
    slf_attn_list = []
    for l in range(N_LAYERS):
        full = attn_slab[:, l * GS:(l + 1) * GS].reshape(H * B, S, H * B, S)
        slf_attn_list.append(full[gi, :, gi, :])               # (H*B, S, S)
    return logits, slf_attn_list


if __name__ == "__main__":
    key = jax.random.PRNGKey(0)
    params = init_params(key)

    # deterministic example inputs with trailing PAD tokens
    inputs = jnp.array([[3, 5, 7, 2, 9, 0, 0, 0],
                        [4, 1, 6, 8, 2, 3, 5, 0]], dtype=jnp.int32)
    pos = jnp.arange(1, S + 1, dtype=jnp.int32)[None, :]
    inputs_pos = jnp.where(inputs != PAD_ID, pos, 0)

    logits, attns = transformer_cm_forward(params, inputs, inputs_pos)
    logits = jax.block_until_ready(logits)
    attns = [jax.block_until_ready(a) for a in attns]

    assert logits.shape == (B, N_CLASSES)
    assert all(a.shape == (B * H, S, S) for a in attns)
    assert bool(jnp.all(jnp.isfinite(logits)))
    for a in attns:
        assert bool(jnp.all(jnp.isfinite(a)))
        assert bool(jnp.allclose(jnp.sum(a, axis=-1), 1.0, atol=1e-2))
    print("KERNEL_OK")
</pallas_src>

<mosaic_0001>
module attributes {stable_mosaic.version = 11 : i64} {
  func.func @fused_transformer_kernel(%arg0: memref<16x32xf32, #tpu.memory_space<vmem>>, %arg1: memref<64x32xf32, #tpu.memory_space<vmem>>, %arg2: memref<12x1x16xf32, #tpu.memory_space<vmem>>, %arg3: memref<2x1x64xf32, #tpu.memory_space<vmem>>, %arg4: memref<12x32x16xbf16, #tpu.memory_space<vmem>>, %arg5: memref<224x32xbf16, #tpu.memory_space<vmem>>, %arg6: memref<2x32x64xbf16, #tpu.memory_space<vmem>>, %arg7: memref<2x32xf32, #tpu.memory_space<vmem>>, %arg8: memref<32x64xf32, #tpu.memory_space<vmem>>) attributes {dimension_semantics = [], scalar_prefetch = 0 : i64, scratch_operands = 0 : i64, tpu.core_type = #tpu.core_type<tc>} {
    %c0 = arith.constant 0 : index
    %c0_0 = arith.constant 0 : index
    %0 = vector.load %arg0[%c0, %c0_0] : memref<16x32xf32, #tpu.memory_space<vmem>>, vector<16x32xf32>
    %c0_1 = arith.constant 0 : index
    %c0_2 = arith.constant 0 : index
    %1 = vector.load %arg1[%c0_1, %c0_2] : memref<64x32xf32, #tpu.memory_space<vmem>>, vector<64x32xf32>
    %c0_3 = arith.constant 0 : index
    %c0_4 = arith.constant 0 : index
    %2 = vector.load %arg5[%c0_3, %c0_4] : memref<224x32xbf16, #tpu.memory_space<vmem>>, vector<224x32xbf16>
    %3 = vector.extract_strided_slice %1 {offsets = [0, 0], sizes = [32, 32], strides = [1, 1]} : vector<64x32xf32> to vector<32x32xf32>
    %4 = vector.extract_strided_slice %1 {offsets = [32, 0], sizes = [16, 32], strides = [1, 1]} : vector<64x32xf32> to vector<16x32xf32>
    %5 = arith.truncf %0 : vector<16x32xf32> to vector<16x32xbf16>
    %c0_5 = arith.constant 0 : index
    %c0_6 = arith.constant 0 : index
    %c0_7 = arith.constant 0 : index
    %6 = vector.load %arg4[%c0_5, %c0_6, %c0_7] : memref<12x32x16xbf16, #tpu.memory_space<vmem>>, vector<1x32x16xbf16>
    %7 = vector.shape_cast %6 : vector<1x32x16xbf16> to vector<32x16xbf16>
    %cst = arith.constant dense<0.000000e+00> : vector<16x16xf32>
    %8 = tpu.matmul %5, %7, %cst {dimension_numbers = #tpu.dot_dimension_numbers<[1], [0], [0], [1], [0, 0, 1, 1], [], []>} : vector<16x32xbf16>, vector<32x16xbf16>, vector<16x16xf32> -> vector<16x16xf32>
    %c0_8 = arith.constant 0 : index
    %c0_9 = arith.constant 0 : index
    %c0_10 = arith.constant 0 : index
    %9 = vector.load %arg2[%c0_8, %c0_9, %c0_10] : memref<12x1x16xf32, #tpu.memory_space<vmem>>, vector<1x1x16xf32>
    %10 = vector.shape_cast %9 : vector<1x1x16xf32> to vector<1x16xf32>
    %11 = vector.broadcast %10 : vector<1x16xf32> to vector<16x16xf32>
    %12 = arith.addf %8, %11 : vector<16x16xf32>
    %c1 = arith.constant 1 : index
    %c0_11 = arith.constant 0 : index
    %c0_12 = arith.constant 0 : index
    %13 = vector.load %arg4[%c1, %c0_11, %c0_12] : memref<12x32x16xbf16, #tpu.memory_space<vmem>>, vector<1x32x16xbf16>
    %14 = vector.shape_cast %13 : vector<1x32x16xbf16> to vector<32x16xbf16>
    %cst_13 = arith.constant dense<0.000000e+00> : vector<16x16xf32>
    %15 = tpu.matmul %5, %14, %cst_13 {dimension_numbers = #tpu.dot_dimension_numbers<[1], [0], [0], [1], [0, 0, 1, 1], [], []>} : vector<16x32xbf16>, vector<32x16xbf16>, vector<16x16xf32> -> vector<16x16xf32>
    %c1_14 = arith.constant 1 : index
    %c0_15 = arith.constant 0 : index
    %c0_16 = arith.constant 0 : index
    %16 = vector.load %arg2[%c1_14, %c0_15, %c0_16] : memref<12x1x16xf32, #tpu.memory_space<vmem>>, vector<1x1x16xf32>
    %17 = vector.shape_cast %16 : vector<1x1x16xf32> to vector<1x16xf32>
    %18 = vector.broadcast %17 : vector<1x16xf32> to vector<16x16xf32>
    %19 = arith.addf %15, %18 : vector<16x16xf32>
    %20 = tpu.concatenate %12, %19 in 0 : vector<16x16xf32>, vector<16x16xf32> -> vector<32x16xf32>
    %c2 = arith.constant 2 : index
    %c0_17 = arith.constant 0 : index
    %c0_18 = arith.constant 0 : index
    %21 = vector.load %arg4[%c2, %c0_17, %c0_18] : memref<12x32x16xbf16, #tpu.memory_space<vmem>>, vector<1x32x16xbf16>
    %22 = vector.shape_cast %21 : vector<1x32x16xbf16> to vector<32x16xbf16>
    %cst_19 = arith.constant dense<0.000000e+00> : vector<16x16xf32>
    %23 = tpu.matmul %5, %22, %cst_19 {dimension_numbers = #tpu.dot_dimension_numbers<[1], [0], [0], [1], [0, 0, 1, 1], [], []>} : vector<16x32xbf16>, vector<32x16xbf16>, vector<16x16xf32> -> vector<16x16xf32>
    %c2_20 = arith.constant 2 : index
    %c0_21 = arith.constant 0 : index
    %c0_22 = arith.constant 0 : index
    %24 = vector.load %arg2[%c2_20, %c0_21, %c0_22] : memref<12x1x16xf32, #tpu.memory_space<vmem>>, vector<1x1x16xf32>
    %25 = vector.shape_cast %24 : vector<1x1x16xf32> to vector<1x16xf32>
    %26 = vector.broadcast %25 : vector<1x16xf32> to vector<16x16xf32>
    %27 = arith.addf %23, %26 : vector<16x16xf32>
    %c3 = arith.constant 3 : index
    %c0_23 = arith.constant 0 : index
    %c0_24 = arith.constant 0 : index
    %28 = vector.load %arg4[%c3, %c0_23, %c0_24] : memref<12x32x16xbf16, #tpu.memory_space<vmem>>, vector<1x32x16xbf16>
    %29 = vector.shape_cast %28 : vector<1x32x16xbf16> to vector<32x16xbf16>
    %cst_25 = arith.constant dense<0.000000e+00> : vector<16x16xf32>
    %30 = tpu.matmul %5, %29, %cst_25 {dimension_numbers = #tpu.dot_dimension_numbers<[1], [0], [0], [1], [0, 0, 1, 1], [], []>} : vector<16x32xbf16>, vector<32x16xbf16>, vector<16x16xf32> -> vector<16x16xf32>
    %c3_26 = arith.constant 3 : index
    %c0_27 = arith.constant 0 : index
    %c0_28 = arith.constant 0 : index
    %31 = vector.load %arg2[%c3_26, %c0_27, %c0_28] : memref<12x1x16xf32, #tpu.memory_space<vmem>>, vector<1x1x16xf32>
    %32 = vector.shape_cast %31 : vector<1x1x16xf32> to vector<1x16xf32>
    %33 = vector.broadcast %32 : vector<1x16xf32> to vector<16x16xf32>
    %34 = arith.addf %30, %33 : vector<16x16xf32>
    %35 = tpu.concatenate %27, %34 in 0 : vector<16x16xf32>, vector<16x16xf32> -> vector<32x16xf32>
    %c4 = arith.constant 4 : index
    %c0_29 = arith.constant 0 : index
    %c0_30 = arith.constant 0 : index
    %36 = vector.load %arg4[%c4, %c0_29, %c0_30] : memref<12x32x16xbf16, #tpu.memory_space<vmem>>, vector<1x32x16xbf16>
    %37 = vector.shape_cast %36 : vector<1x32x16xbf16> to vector<32x16xbf16>
    %cst_31 = arith.constant dense<0.000000e+00> : vector<16x16xf32>
    %38 = tpu.matmul %5, %37, %cst_31 {dimension_numbers = #tpu.dot_dimension_numbers<[1], [0], [0], [1], [0, 0, 1, 1], [], []>} : vector<16x32xbf16>, vector<32x16xbf16>, vector<16x16xf32> -> vector<16x16xf32>
    %c4_32 = arith.constant 4 : index
    %c0_33 = arith.constant 0 : index
    %c0_34 = arith.constant 0 : index
    %39 = vector.load %arg2[%c4_32, %c0_33, %c0_34] : memref<12x1x16xf32, #tpu.memory_space<vmem>>, vector<1x1x16xf32>
    %40 = vector.shape_cast %39 : vector<1x1x16xf32> to vector<1x16xf32>
    %41 = vector.broadcast %40 : vector<1x16xf32> to vector<16x16xf32>
    %42 = arith.addf %38, %41 : vector<16x16xf32>
    %c5 = arith.constant 5 : index
    %c0_35 = arith.constant 0 : index
    %c0_36 = arith.constant 0 : index
    %43 = vector.load %arg4[%c5, %c0_35, %c0_36] : memref<12x32x16xbf16, #tpu.memory_space<vmem>>, vector<1x32x16xbf16>
    %44 = vector.shape_cast %43 : vector<1x32x16xbf16> to vector<32x16xbf16>
    %cst_37 = arith.constant dense<0.000000e+00> : vector<16x16xf32>
    %45 = tpu.matmul %5, %44, %cst_37 {dimension_numbers = #tpu.dot_dimension_numbers<[1], [0], [0], [1], [0, 0, 1, 1], [], []>} : vector<16x32xbf16>, vector<32x16xbf16>, vector<16x16xf32> -> vector<16x16xf32>
    %c5_38 = arith.constant 5 : index
    %c0_39 = arith.constant 0 : index
    %c0_40 = arith.constant 0 : index
    %46 = vector.load %arg2[%c5_38, %c0_39, %c0_40] : memref<12x1x16xf32, #tpu.memory_space<vmem>>, vector<1x1x16xf32>
    %47 = vector.shape_cast %46 : vector<1x1x16xf32> to vector<1x16xf32>
    %48 = vector.broadcast %47 : vector<1x16xf32> to vector<16x16xf32>
    %49 = arith.addf %45, %48 : vector<16x16xf32>
    %50 = tpu.concatenate %42, %49 in 0 : vector<16x16xf32>, vector<16x16xf32> -> vector<32x16xf32>
    %cst_41 = arith.constant dense<0.000000e+00> : vector<32x32xf32>
    %51 = tpu.matmul %20, %35, %cst_41 {dimension_numbers = #tpu.dot_dimension_numbers<[1], [1], [0], [0], [0, 0, 1, 0], [], []>} : vector<32x16xf32>, vector<32x16xf32>, vector<32x32xf32> -> vector<32x32xf32>
    %52 = arith.addf %51, %3 : vector<32x32xf32>
    %cst_42 = arith.constant dense<0xFF800000> : vector<32xf32>
    %53 = vector.multi_reduction <maximumf>, %52, %cst_42 [1] : vector<32x32xf32> to vector<32xf32>
    %54 = vector.shape_cast %53 : vector<32xf32> to vector<32x1xf32>
    %55 = vector.broadcast %54 : vector<32x1xf32> to vector<32x32xf32>
    %56 = arith.subf %52, %55 : vector<32x32xf32>
    %57 = math.exp %56 : vector<32x32xf32>
    %cst_43 = arith.constant dense<0.000000e+00> : vector<32xf32>
    %58 = vector.multi_reduction <add>, %57, %cst_43 [1] : vector<32x32xf32> to vector<32xf32>
    %59 = vector.shape_cast %58 : vector<32xf32> to vector<32x1xf32>
    %60 = vector.broadcast %59 : vector<32x1xf32> to vector<32x32xf32>
    %61 = arith.divf %57, %60 : vector<32x32xf32>
    %cst_44 = arith.constant dense<0.000000e+00> : vector<32x16xf32>
    %62 = tpu.matmul %61, %50, %cst_44 {dimension_numbers = #tpu.dot_dimension_numbers<[1], [0], [0], [1], [0, 0, 1, 1], [], []>} : vector<32x32xf32>, vector<32x16xf32>, vector<32x16xf32> -> vector<32x16xf32>
    %63 = vector.extract_strided_slice %2 {offsets = [0, 0], sizes = [16, 32], strides = [1, 1]} : vector<224x32xbf16> to vector<16x32xbf16>
    %64 = vector.extract_strided_slice %2 {offsets = [16, 0], sizes = [16, 32], strides = [1, 1]} : vector<224x32xbf16> to vector<16x32xbf16>
    %65 = vector.extract_strided_slice %1 {offsets = [48, 0], sizes = [1, 32], strides = [1, 1]} : vector<64x32xf32> to vector<1x32xf32>
    %66 = vector.extract_strided_slice %62 {offsets = [0, 0], sizes = [16, 16], strides = [1, 1]} : vector<32x16xf32> to vector<16x16xf32>
    %67 = arith.truncf %66 : vector<16x16xf32> to vector<16x16xbf16>
    %cst_45 = arith.constant dense<0.000000e+00> : vector<16x32xf32>
    %68 = tpu.matmul %67, %63, %cst_45 {dimension_numbers = #tpu.dot_dimension_numbers<[1], [0], [0], [1], [0, 0, 1, 1], [], []>} : vector<16x16xbf16>, vector<16x32xbf16>, vector<16x32xf32> -> vector<16x32xf32>
    %69 = vector.extract_strided_slice %62 {offsets = [16, 0], sizes = [16, 16], strides = [1, 1]} : vector<32x16xf32> to vector<16x16xf32>
    %70 = arith.truncf %69 : vector<16x16xf32> to vector<16x16xbf16>
    %cst_46 = arith.constant dense<0.000000e+00> : vector<16x32xf32>
    %71 = tpu.matmul %70, %64, %cst_46 {dimension_numbers = #tpu.dot_dimension_numbers<[1], [0], [0], [1], [0, 0, 1, 1], [], []>} : vector<16x16xbf16>, vector<16x32xbf16>, vector<16x32xf32> -> vector<16x32xf32>
    %72 = arith.addf %68, %71 : vector<16x32xf32>
    %73 = vector.broadcast %65 : vector<1x32xf32> to vector<16x32xf32>
    %74 = arith.addf %72, %73 : vector<16x32xf32>
    %75 = arith.addf %74, %0 : vector<16x32xf32>
    %cst_47 = arith.constant dense<0.000000e+00> : vector<16xf32>
    %76 = vector.multi_reduction <add>, %75, %cst_47 [1] : vector<16x32xf32> to vector<16xf32>
    %77 = vector.shape_cast %76 : vector<16xf32> to vector<16x1xf32>
    %cst_48 = arith.constant 3.200000e+01 : f32
    %78 = vector.broadcast %cst_48 : f32 to vector<16x1xf32>
    %79 = arith.divf %77, %78 : vector<16x1xf32>
    %80 = vector.broadcast %79 : vector<16x1xf32> to vector<16x32xf32>
    %81 = arith.subf %75, %80 : vector<16x32xf32>
    %82 = arith.mulf %81, %81 : vector<16x32xf32>
    %cst_49 = arith.constant dense<0.000000e+00> : vector<16xf32>
    %83 = vector.multi_reduction <add>, %82, %cst_49 [1] : vector<16x32xf32> to vector<16xf32>
    %84 = vector.shape_cast %83 : vector<16xf32> to vector<16x1xf32>
    %cst_50 = arith.constant 3.200000e+01 : f32
    %85 = vector.broadcast %cst_50 : f32 to vector<16x1xf32>
    %86 = arith.divf %84, %85 : vector<16x1xf32>
    %87 = vector.broadcast %79 : vector<16x1xf32> to vector<16x32xf32>
    %88 = arith.subf %75, %87 : vector<16x32xf32>
    %cst_51 = arith.constant 9.99999974E-6 : f32
    %89 = vector.broadcast %cst_51 : f32 to vector<16x1xf32>
    %90 = arith.addf %86, %89 : vector<16x1xf32>
    %91 = math.rsqrt %90 : vector<16x1xf32>
    %92 = vector.broadcast %91 : vector<16x1xf32> to vector<16x32xf32>
    %93 = arith.mulf %88, %92 : vector<16x32xf32>
    %94 = vector.extract_strided_slice %1 {offsets = [49, 0], sizes = [1, 32], strides = [1, 1]} : vector<64x32xf32> to vector<1x32xf32>
    %95 = vector.broadcast %94 : vector<1x32xf32> to vector<16x32xf32>
    %96 = arith.mulf %93, %95 : vector<16x32xf32>
    %97 = vector.extract_strided_slice %1 {offsets = [50, 0], sizes = [1, 32], strides = [1, 1]} : vector<64x32xf32> to vector<1x32xf32>
    %98 = vector.broadcast %97 : vector<1x32xf32> to vector<16x32xf32>
    %99 = arith.addf %96, %98 : vector<16x32xf32>
    %100 = arith.mulf %99, %4 : vector<16x32xf32>
    %101 = arith.truncf %100 : vector<16x32xf32> to vector<16x32xbf16>
    %c0_52 = arith.constant 0 : index
    %c0_53 = arith.constant 0 : index
    %c0_54 = arith.constant 0 : index
    %102 = vector.load %arg6[%c0_52, %c0_53, %c0_54] : memref<2x32x64xbf16, #tpu.memory_space<vmem>>, vector<1x32x64xbf16>
    %103 = vector.shape_cast %102 : vector<1x32x64xbf16> to vector<32x64xbf16>
    %cst_55 = arith.constant dense<0.000000e+00> : vector<16x64xf32>
    %104 = tpu.matmul %101, %103, %cst_55 {dimension_numbers = #tpu.dot_dimension_numbers<[1], [0], [0], [1], [0, 0, 1, 1], [], []>} : vector<16x32xbf16>, vector<32x64xbf16>, vector<16x64xf32> -> vector<16x64xf32>
    %c0_56 = arith.constant 0 : index
    %c0_57 = arith.constant 0 : index
    %c0_58 = arith.constant 0 : index
    %105 = vector.load %arg3[%c0_56, %c0_57, %c0_58] : memref<2x1x64xf32, #tpu.memory_space<vmem>>, vector<1x1x64xf32>
    %106 = vector.shape_cast %105 : vector<1x1x64xf32> to vector<1x64xf32>
    %107 = vector.broadcast %106 : vector<1x64xf32> to vector<16x64xf32>
    %108 = arith.addf %104, %107 : vector<16x64xf32>
    %cst_59 = arith.constant 0.000000e+00 : f32
    %109 = vector.broadcast %cst_59 : f32 to vector<16x64xf32>
    %110 = arith.maximumf %108, %109 : vector<16x64xf32>
    %111 = vector.extract_strided_slice %2 {offsets = [32, 0], sizes = [64, 32], strides = [1, 1]} : vector<224x32xbf16> to vector<64x32xbf16>
    %112 = arith.truncf %110 : vector<16x64xf32> to vector<16x64xbf16>
    %cst_60 = arith.constant dense<0.000000e+00> : vector<16x32xf32>
    %113 = tpu.matmul %112, %111, %cst_60 {dimension_numbers = #tpu.dot_dimension_numbers<[1], [0], [0], [1], [0, 0, 1, 1], [], []>} : vector<16x64xbf16>, vector<64x32xbf16>, vector<16x32xf32> -> vector<16x32xf32>
    %114 = vector.extract_strided_slice %1 {offsets = [51, 0], sizes = [1, 32], strides = [1, 1]} : vector<64x32xf32> to vector<1x32xf32>
    %115 = vector.broadcast %114 : vector<1x32xf32> to vector<16x32xf32>
    %116 = arith.addf %113, %115 : vector<16x32xf32>
    %117 = arith.addf %116, %100 : vector<16x32xf32>
    %cst_61 = arith.constant dense<0.000000e+00> : vector<16xf32>
    %118 = vector.multi_reduction <add>, %117, %cst_61 [1] : vector<16x32xf32> to vector<16xf32>
    %119 = vector.shape_cast %118 : vector<16xf32> to vector<16x1xf32>
    %cst_62 = arith.constant 3.200000e+01 : f32
    %120 = vector.broadcast %cst_62 : f32 to vector<16x1xf32>
    %121 = arith.divf %119, %120 : vector<16x1xf32>
    %122 = vector.broadcast %121 : vector<16x1xf32> to vector<16x32xf32>
    %123 = arith.subf %117, %122 : vector<16x32xf32>
    %124 = arith.mulf %123, %123 : vector<16x32xf32>
    %cst_63 = arith.constant dense<0.000000e+00> : vector<16xf32>
    %125 = vector.multi_reduction <add>, %124, %cst_63 [1] : vector<16x32xf32> to vector<16xf32>
    %126 = vector.shape_cast %125 : vector<16xf32> to vector<16x1xf32>
    %cst_64 = arith.constant 3.200000e+01 : f32
    %127 = vector.broadcast %cst_64 : f32 to vector<16x1xf32>
    %128 = arith.divf %126, %127 : vector<16x1xf32>
    %129 = vector.broadcast %121 : vector<16x1xf32> to vector<16x32xf32>
    %130 = arith.subf %117, %129 : vector<16x32xf32>
    %cst_65 = arith.constant 9.99999974E-6 : f32
    %131 = vector.broadcast %cst_65 : f32 to vector<16x1xf32>
    %132 = arith.addf %128, %131 : vector<16x1xf32>
    %133 = math.rsqrt %132 : vector<16x1xf32>
    %134 = vector.broadcast %133 : vector<16x1xf32> to vector<16x32xf32>
    %135 = arith.mulf %130, %134 : vector<16x32xf32>
    %136 = vector.extract_strided_slice %1 {offsets = [52, 0], sizes = [1, 32], strides = [1, 1]} : vector<64x32xf32> to vector<1x32xf32>
    %137 = vector.broadcast %136 : vector<1x32xf32> to vector<16x32xf32>
    %138 = arith.mulf %135, %137 : vector<16x32xf32>
    %139 = vector.extract_strided_slice %1 {offsets = [53, 0], sizes = [1, 32], strides = [1, 1]} : vector<64x32xf32> to vector<1x32xf32>
    %140 = vector.broadcast %139 : vector<1x32xf32> to vector<16x32xf32>
    %141 = arith.addf %138, %140 : vector<16x32xf32>
    %142 = arith.mulf %141, %4 : vector<16x32xf32>
    %143 = arith.truncf %142 : vector<16x32xf32> to vector<16x32xbf16>
    %c6 = arith.constant 6 : index
    %c0_66 = arith.constant 0 : index
    %c0_67 = arith.constant 0 : index
    %144 = vector.load %arg4[%c6, %c0_66, %c0_67] : memref<12x32x16xbf16, #tpu.memory_space<vmem>>, vector<1x32x16xbf16>
    %145 = vector.shape_cast %144 : vector<1x32x16xbf16> to vector<32x16xbf16>
    %cst_68 = arith.constant dense<0.000000e+00> : vector<16x16xf32>
    %146 = tpu.matmul %143, %145, %cst_68 {dimension_numbers = #tpu.dot_dimension_numbers<[1], [0], [0], [1], [0, 0, 1, 1], [], []>} : vector<16x32xbf16>, vector<32x16xbf16>, vector<16x16xf32> -> vector<16x16xf32>
    %c6_69 = arith.constant 6 : index
    %c0_70 = arith.constant 0 : index
    %c0_71 = arith.constant 0 : index
    %147 = vector.load %arg2[%c6_69, %c0_70, %c0_71] : memref<12x1x16xf32, #tpu.memory_space<vmem>>, vector<1x1x16xf32>
    %148 = vector.shape_cast %147 : vector<1x1x16xf32> to vector<1x16xf32>
    %149 = vector.broadcast %148 : vector<1x16xf32> to vector<16x16xf32>
    %150 = arith.addf %146, %149 : vector<16x16xf32>
    %c7 = arith.constant 7 : index
    %c0_72 = arith.constant 0 : index
    %c0_73 = arith.constant 0 : index
    %151 = vector.load %arg4[%c7, %c0_72, %c0_73] : memref<12x32x16xbf16, #tpu.memory_space<vmem>>, vector<1x32x16xbf16>
    %152 = vector.shape_cast %151 : vector<1x32x16xbf16> to vector<32x16xbf16>
    %cst_74 = arith.constant dense<0.000000e+00> : vector<16x16xf32>
    %153 = tpu.matmul %143, %152, %cst_74 {dimension_numbers = #tpu.dot_dimension_numbers<[1], [0], [0], [1], [0, 0, 1, 1], [], []>} : vector<16x32xbf16>, vector<32x16xbf16>, vector<16x16xf32> -> vector<16x16xf32>
    %c7_75 = arith.constant 7 : index
    %c0_76 = arith.constant 0 : index
    %c0_77 = arith.constant 0 : index
    %154 = vector.load %arg2[%c7_75, %c0_76, %c0_77] : memref<12x1x16xf32, #tpu.memory_space<vmem>>, vector<1x1x16xf32>
    %155 = vector.shape_cast %154 : vector<1x1x16xf32> to vector<1x16xf32>
    %156 = vector.broadcast %155 : vector<1x16xf32> to vector<16x16xf32>
    %157 = arith.addf %153, %156 : vector<16x16xf32>
    %158 = tpu.concatenate %150, %157 in 0 : vector<16x16xf32>, vector<16x16xf32> -> vector<32x16xf32>
    %c8 = arith.constant 8 : index
    %c0_78 = arith.constant 0 : index
    %c0_79 = arith.constant 0 : index
    %159 = vector.load %arg4[%c8, %c0_78, %c0_79] : memref<12x32x16xbf16, #tpu.memory_space<vmem>>, vector<1x32x16xbf16>
    %160 = vector.shape_cast %159 : vector<1x32x16xbf16> to vector<32x16xbf16>
    %cst_80 = arith.constant dense<0.000000e+00> : vector<16x16xf32>
    %161 = tpu.matmul %143, %160, %cst_80 {dimension_numbers = #tpu.dot_dimension_numbers<[1], [0], [0], [1], [0, 0, 1, 1], [], []>} : vector<16x32xbf16>, vector<32x16xbf16>, vector<16x16xf32> -> vector<16x16xf32>
    %c8_81 = arith.constant 8 : index
    %c0_82 = arith.constant 0 : index
    %c0_83 = arith.constant 0 : index
    %162 = vector.load %arg2[%c8_81, %c0_82, %c0_83] : memref<12x1x16xf32, #tpu.memory_space<vmem>>, vector<1x1x16xf32>
    %163 = vector.shape_cast %162 : vector<1x1x16xf32> to vector<1x16xf32>
    %164 = vector.broadcast %163 : vector<1x16xf32> to vector<16x16xf32>
    %165 = arith.addf %161, %164 : vector<16x16xf32>
    %c9 = arith.constant 9 : index
    %c0_84 = arith.constant 0 : index
    %c0_85 = arith.constant 0 : index
    %166 = vector.load %arg4[%c9, %c0_84, %c0_85] : memref<12x32x16xbf16, #tpu.memory_space<vmem>>, vector<1x32x16xbf16>
    %167 = vector.shape_cast %166 : vector<1x32x16xbf16> to vector<32x16xbf16>
    %cst_86 = arith.constant dense<0.000000e+00> : vector<16x16xf32>
    %168 = tpu.matmul %143, %167, %cst_86 {dimension_numbers = #tpu.dot_dimension_numbers<[1], [0], [0], [1], [0, 0, 1, 1], [], []>} : vector<16x32xbf16>, vector<32x16xbf16>, vector<16x16xf32> -> vector<16x16xf32>
    %c9_87 = arith.constant 9 : index
    %c0_88 = arith.constant 0 : index
    %c0_89 = arith.constant 0 : index
    %169 = vector.load %arg2[%c9_87, %c0_88, %c0_89] : memref<12x1x16xf32, #tpu.memory_space<vmem>>, vector<1x1x16xf32>
    %170 = vector.shape_cast %169 : vector<1x1x16xf32> to vector<1x16xf32>
    %171 = vector.broadcast %170 : vector<1x16xf32> to vector<16x16xf32>
    %172 = arith.addf %168, %171 : vector<16x16xf32>
    %173 = tpu.concatenate %165, %172 in 0 : vector<16x16xf32>, vector<16x16xf32> -> vector<32x16xf32>
    %c10 = arith.constant 10 : index
    %c0_90 = arith.constant 0 : index
    %c0_91 = arith.constant 0 : index
    %174 = vector.load %arg4[%c10, %c0_90, %c0_91] : memref<12x32x16xbf16, #tpu.memory_space<vmem>>, vector<1x32x16xbf16>
    %175 = vector.shape_cast %174 : vector<1x32x16xbf16> to vector<32x16xbf16>
    %cst_92 = arith.constant dense<0.000000e+00> : vector<16x16xf32>
    %176 = tpu.matmul %143, %175, %cst_92 {dimension_numbers = #tpu.dot_dimension_numbers<[1], [0], [0], [1], [0, 0, 1, 1], [], []>} : vector<16x32xbf16>, vector<32x16xbf16>, vector<16x16xf32> -> vector<16x16xf32>
    %c10_93 = arith.constant 10 : index
    %c0_94 = arith.constant 0 : index
    %c0_95 = arith.constant 0 : index
    %177 = vector.load %arg2[%c10_93, %c0_94, %c0_95] : memref<12x1x16xf32, #tpu.memory_space<vmem>>, vector<1x1x16xf32>
    %178 = vector.shape_cast %177 : vector<1x1x16xf32> to vector<1x16xf32>
    %179 = vector.broadcast %178 : vector<1x16xf32> to vector<16x16xf32>
    %180 = arith.addf %176, %179 : vector<16x16xf32>
    %c11 = arith.constant 11 : index
    %c0_96 = arith.constant 0 : index
    %c0_97 = arith.constant 0 : index
    %181 = vector.load %arg4[%c11, %c0_96, %c0_97] : memref<12x32x16xbf16, #tpu.memory_space<vmem>>, vector<1x32x16xbf16>
    %182 = vector.shape_cast %181 : vector<1x32x16xbf16> to vector<32x16xbf16>
    %cst_98 = arith.constant dense<0.000000e+00> : vector<16x16xf32>
    %183 = tpu.matmul %143, %182, %cst_98 {dimension_numbers = #tpu.dot_dimension_numbers<[1], [0], [0], [1], [0, 0, 1, 1], [], []>} : vector<16x32xbf16>, vector<32x16xbf16>, vector<16x16xf32> -> vector<16x16xf32>
    %c11_99 = arith.constant 11 : index
    %c0_100 = arith.constant 0 : index
    %c0_101 = arith.constant 0 : index
    %184 = vector.load %arg2[%c11_99, %c0_100, %c0_101] : memref<12x1x16xf32, #tpu.memory_space<vmem>>, vector<1x1x16xf32>
    %185 = vector.shape_cast %184 : vector<1x1x16xf32> to vector<1x16xf32>
    %186 = vector.broadcast %185 : vector<1x16xf32> to vector<16x16xf32>
    %187 = arith.addf %183, %186 : vector<16x16xf32>
    %188 = tpu.concatenate %180, %187 in 0 : vector<16x16xf32>, vector<16x16xf32> -> vector<32x16xf32>
    %cst_102 = arith.constant dense<0.000000e+00> : vector<32x32xf32>
    %189 = tpu.matmul %158, %173, %cst_102 {dimension_numbers = #tpu.dot_dimension_numbers<[1], [1], [0], [0], [0, 0, 1, 0], [], []>} : vector<32x16xf32>, vector<32x16xf32>, vector<32x32xf32> -> vector<32x32xf32>
    %190 = arith.addf %189, %3 : vector<32x32xf32>
    %cst_103 = arith.constant dense<0xFF800000> : vector<32xf32>
    %191 = vector.multi_reduction <maximumf>, %190, %cst_103 [1] : vector<32x32xf32> to vector<32xf32>
    %192 = vector.shape_cast %191 : vector<32xf32> to vector<32x1xf32>
    %193 = vector.broadcast %192 : vector<32x1xf32> to vector<32x32xf32>
    %194 = arith.subf %190, %193 : vector<32x32xf32>
    %195 = math.exp %194 : vector<32x32xf32>
    %cst_104 = arith.constant dense<0.000000e+00> : vector<32xf32>
    %196 = vector.multi_reduction <add>, %195, %cst_104 [1] : vector<32x32xf32> to vector<32xf32>
    %197 = vector.shape_cast %196 : vector<32xf32> to vector<32x1xf32>
    %198 = vector.broadcast %197 : vector<32x1xf32> to vector<32x32xf32>
    %199 = arith.divf %195, %198 : vector<32x32xf32>
    %cst_105 = arith.constant dense<0.000000e+00> : vector<32x16xf32>
    %200 = tpu.matmul %199, %188, %cst_105 {dimension_numbers = #tpu.dot_dimension_numbers<[1], [0], [0], [1], [0, 0, 1, 1], [], []>} : vector<32x32xf32>, vector<32x16xf32>, vector<32x16xf32> -> vector<32x16xf32>
    %201 = vector.extract_strided_slice %2 {offsets = [96, 0], sizes = [16, 32], strides = [1, 1]} : vector<224x32xbf16> to vector<16x32xbf16>
    %202 = vector.extract_strided_slice %2 {offsets = [112, 0], sizes = [16, 32], strides = [1, 1]} : vector<224x32xbf16> to vector<16x32xbf16>
    %203 = vector.extract_strided_slice %1 {offsets = [54, 0], sizes = [1, 32], strides = [1, 1]} : vector<64x32xf32> to vector<1x32xf32>
    %204 = vector.extract_strided_slice %200 {offsets = [0, 0], sizes = [16, 16], strides = [1, 1]} : vector<32x16xf32> to vector<16x16xf32>
    %205 = arith.truncf %204 : vector<16x16xf32> to vector<16x16xbf16>
    %cst_106 = arith.constant dense<0.000000e+00> : vector<16x32xf32>
    %206 = tpu.matmul %205, %201, %cst_106 {dimension_numbers = #tpu.dot_dimension_numbers<[1], [0], [0], [1], [0, 0, 1, 1], [], []>} : vector<16x16xbf16>, vector<16x32xbf16>, vector<16x32xf32> -> vector<16x32xf32>
    %207 = vector.extract_strided_slice %200 {offsets = [16, 0], sizes = [16, 16], strides = [1, 1]} : vector<32x16xf32> to vector<16x16xf32>
    %208 = arith.truncf %207 : vector<16x16xf32> to vector<16x16xbf16>
    %cst_107 = arith.constant dense<0.000000e+00> : vector<16x32xf32>
    %209 = tpu.matmul %208, %202, %cst_107 {dimension_numbers = #tpu.dot_dimension_numbers<[1], [0], [0], [1], [0, 0, 1, 1], [], []>} : vector<16x16xbf16>, vector<16x32xbf16>, vector<16x32xf32> -> vector<16x32xf32>
    %210 = arith.addf %206, %209 : vector<16x32xf32>
    %211 = vector.broadcast %203 : vector<1x32xf32> to vector<16x32xf32>
    %212 = arith.addf %210, %211 : vector<16x32xf32>
    %213 = arith.addf %212, %142 : vector<16x32xf32>
    %cst_108 = arith.constant dense<0.000000e+00> : vector<16xf32>
    %214 = vector.multi_reduction <add>, %213, %cst_108 [1] : vector<16x32xf32> to vector<16xf32>
    %215 = vector.shape_cast %214 : vector<16xf32> to vector<16x1xf32>
    %cst_109 = arith.constant 3.200000e+01 : f32
    %216 = vector.broadcast %cst_109 : f32 to vector<16x1xf32>
    %217 = arith.divf %215, %216 : vector<16x1xf32>
    %218 = vector.broadcast %217 : vector<16x1xf32> to vector<16x32xf32>
    %219 = arith.subf %213, %218 : vector<16x32xf32>
    %220 = arith.mulf %219, %219 : vector<16x32xf32>
    %cst_110 = arith.constant dense<0.000000e+00> : vector<16xf32>
    %221 = vector.multi_reduction <add>, %220, %cst_110 [1] : vector<16x32xf32> to vector<16xf32>
    %222 = vector.shape_cast %221 : vector<16xf32> to vector<16x1xf32>
    %cst_111 = arith.constant 3.200000e+01 : f32
    %223 = vector.broadcast %cst_111 : f32 to vector<16x1xf32>
    %224 = arith.divf %222, %223 : vector<16x1xf32>
    %225 = vector.broadcast %217 : vector<16x1xf32> to vector<16x32xf32>
    %226 = arith.subf %213, %225 : vector<16x32xf32>
    %cst_112 = arith.constant 9.99999974E-6 : f32
    %227 = vector.broadcast %cst_112 : f32 to vector<16x1xf32>
    %228 = arith.addf %224, %227 : vector<16x1xf32>
    %229 = math.rsqrt %228 : vector<16x1xf32>
    %230 = vector.broadcast %229 : vector<16x1xf32> to vector<16x32xf32>
    %231 = arith.mulf %226, %230 : vector<16x32xf32>
    %232 = vector.extract_strided_slice %1 {offsets = [55, 0], sizes = [1, 32], strides = [1, 1]} : vector<64x32xf32> to vector<1x32xf32>
    %233 = vector.broadcast %232 : vector<1x32xf32> to vector<16x32xf32>
    %234 = arith.mulf %231, %233 : vector<16x32xf32>
    %235 = vector.extract_strided_slice %1 {offsets = [56, 0], sizes = [1, 32], strides = [1, 1]} : vector<64x32xf32> to vector<1x32xf32>
    %236 = vector.broadcast %235 : vector<1x32xf32> to vector<16x32xf32>
    %237 = arith.addf %234, %236 : vector<16x32xf32>
    %238 = arith.mulf %237, %4 : vector<16x32xf32>
    %239 = arith.truncf %238 : vector<16x32xf32> to vector<16x32xbf16>
    %c1_113 = arith.constant 1 : index
    %c0_114 = arith.constant 0 : index
    %c0_115 = arith.constant 0 : index
    %240 = vector.load %arg6[%c1_113, %c0_114, %c0_115] : memref<2x32x64xbf16, #tpu.memory_space<vmem>>, vector<1x32x64xbf16>
    %241 = vector.shape_cast %240 : vector<1x32x64xbf16> to vector<32x64xbf16>
    %cst_116 = arith.constant dense<0.000000e+00> : vector<16x64xf32>
    %242 = tpu.matmul %239, %241, %cst_116 {dimension_numbers = #tpu.dot_dimension_numbers<[1], [0], [0], [1], [0, 0, 1, 1], [], []>} : vector<16x32xbf16>, vector<32x64xbf16>, vector<16x64xf32> -> vector<16x64xf32>
    %c1_117 = arith.constant 1 : index
    %c0_118 = arith.constant 0 : index
    %c0_119 = arith.constant 0 : index
    %243 = vector.load %arg3[%c1_117, %c0_118, %c0_119] : memref<2x1x64xf32, #tpu.memory_space<vmem>>, vector<1x1x64xf32>
    %244 = vector.shape_cast %243 : vector<1x1x64xf32> to vector<1x64xf32>
    %245 = vector.broadcast %244 : vector<1x64xf32> to vector<16x64xf32>
    %246 = arith.addf %242, %245 : vector<16x64xf32>
    %cst_120 = arith.constant 0.000000e+00 : f32
    %247 = vector.broadcast %cst_120 : f32 to vector<16x64xf32>
    %248 = arith.maximumf %246, %247 : vector<16x64xf32>
    %249 = vector.extract_strided_slice %2 {offsets = [128, 0], sizes = [64, 32], strides = [1, 1]} : vector<224x32xbf16> to vector<64x32xbf16>
    %250 = arith.truncf %248 : vector<16x64xf32> to vector<16x64xbf16>
    %cst_121 = arith.constant dense<0.000000e+00> : vector<16x32xf32>
    %251 = tpu.matmul %250, %249, %cst_121 {dimension_numbers = #tpu.dot_dimension_numbers<[1], [0], [0], [1], [0, 0, 1, 1], [], []>} : vector<16x64xbf16>, vector<64x32xbf16>, vector<16x32xf32> -> vector<16x32xf32>
    %252 = vector.extract_strided_slice %1 {offsets = [57, 0], sizes = [1, 32], strides = [1, 1]} : vector<64x32xf32> to vector<1x32xf32>
    %253 = vector.broadcast %252 : vector<1x32xf32> to vector<16x32xf32>
    %254 = arith.addf %251, %253 : vector<16x32xf32>
    %255 = arith.addf %254, %238 : vector<16x32xf32>
    %cst_122 = arith.constant dense<0.000000e+00> : vector<16xf32>
    %256 = vector.multi_reduction <add>, %255, %cst_122 [1] : vector<16x32xf32> to vector<16xf32>
    %257 = vector.shape_cast %256 : vector<16xf32> to vector<16x1xf32>
    %cst_123 = arith.constant 3.200000e+01 : f32
    %258 = vector.broadcast %cst_123 : f32 to vector<16x1xf32>
    %259 = arith.divf %257, %258 : vector<16x1xf32>
    %260 = vector.broadcast %259 : vector<16x1xf32> to vector<16x32xf32>
    %261 = arith.subf %255, %260 : vector<16x32xf32>
    %262 = arith.mulf %261, %261 : vector<16x32xf32>
    %cst_124 = arith.constant dense<0.000000e+00> : vector<16xf32>
    %263 = vector.multi_reduction <add>, %262, %cst_124 [1] : vector<16x32xf32> to vector<16xf32>
    %264 = vector.shape_cast %263 : vector<16xf32> to vector<16x1xf32>
    %cst_125 = arith.constant 3.200000e+01 : f32
    %265 = vector.broadcast %cst_125 : f32 to vector<16x1xf32>
    %266 = arith.divf %264, %265 : vector<16x1xf32>
    %267 = vector.broadcast %259 : vector<16x1xf32> to vector<16x32xf32>
    %268 = arith.subf %255, %267 : vector<16x32xf32>
    %cst_126 = arith.constant 9.99999974E-6 : f32
    %269 = vector.broadcast %cst_126 : f32 to vector<16x1xf32>
    %270 = arith.addf %266, %269 : vector<16x1xf32>
    %271 = math.rsqrt %270 : vector<16x1xf32>
    %272 = vector.broadcast %271 : vector<16x1xf32> to vector<16x32xf32>
    %273 = arith.mulf %268, %272 : vector<16x32xf32>
    %274 = vector.extract_strided_slice %1 {offsets = [58, 0], sizes = [1, 32], strides = [1, 1]} : vector<64x32xf32> to vector<1x32xf32>
    %275 = vector.broadcast %274 : vector<1x32xf32> to vector<16x32xf32>
    %276 = arith.mulf %273, %275 : vector<16x32xf32>
    %277 = vector.extract_strided_slice %1 {offsets = [59, 0], sizes = [1, 32], strides = [1, 1]} : vector<64x32xf32> to vector<1x32xf32>
    %278 = vector.broadcast %277 : vector<1x32xf32> to vector<16x32xf32>
    %279 = arith.addf %276, %278 : vector<16x32xf32>
    %280 = arith.mulf %279, %4 : vector<16x32xf32>
    %281 = vector.extract_strided_slice %280 {offsets = [0, 0], sizes = [8, 32], strides = [1, 1]} : vector<16x32xf32> to vector<8x32xf32>
    %cst_127 = arith.constant dense<0xFF800000> : vector<32xf32>
    %282 = vector.multi_reduction <maximumf>, %281, %cst_127 [0] : vector<8x32xf32> to vector<32xf32>
    %283 = vector.shape_cast %282 : vector<32xf32> to vector<1x32xf32>
    %284 = vector.extract_strided_slice %280 {offsets = [8, 0], sizes = [8, 32], strides = [1, 1]} : vector<16x32xf32> to vector<8x32xf32>
    %cst_128 = arith.constant dense<0xFF800000> : vector<32xf32>
    %285 = vector.multi_reduction <maximumf>, %284, %cst_128 [0] : vector<8x32xf32> to vector<32xf32>
    %286 = vector.shape_cast %285 : vector<32xf32> to vector<1x32xf32>
    %287 = tpu.concatenate %283, %286 in 0 : vector<1x32xf32>, vector<1x32xf32> -> vector<2x32xf32>
    %288 = vector.extract_strided_slice %2 {offsets = [192, 0], sizes = [32, 32], strides = [1, 1]} : vector<224x32xbf16> to vector<32x32xbf16>
    %289 = vector.extract_strided_slice %1 {offsets = [60, 0], sizes = [1, 32], strides = [1, 1]} : vector<64x32xf32> to vector<1x32xf32>
    %290 = arith.truncf %287 : vector<2x32xf32> to vector<2x32xbf16>
    %cst_129 = arith.constant dense<0.000000e+00> : vector<2x32xf32>
    %291 = tpu.matmul %290, %288, %cst_129 {dimension_numbers = #tpu.dot_dimension_numbers<[1], [0], [0], [1], [0, 0, 1, 1], [], []>} : vector<2x32xbf16>, vector<32x32xbf16>, vector<2x32xf32> -> vector<2x32xf32>
    %292 = vector.broadcast %289 : vector<1x32xf32> to vector<2x32xf32>
    %293 = arith.addf %291, %292 : vector<2x32xf32>
    %c0_130 = arith.constant 0 : index
    %c0_131 = arith.constant 0 : index
    %294 = vector.load %arg7[%c0_130, %c0_131] : memref<2x32xf32, #tpu.memory_space<vmem>>, vector<2x32xf32>
    tpu.vector_store %arg7[%c0_130, %c0_131], %293 {strides = array<i32>} : memref<2x32xf32, #tpu.memory_space<vmem>>, vector<2x32xf32>,
    %295 = tpu.concatenate %61, %199 in 1 : vector<32x32xf32>, vector<32x32xf32> -> vector<32x64xf32>
    %c0_132 = arith.constant 0 : index
    %c0_133 = arith.constant 0 : index
    %296 = vector.load %arg8[%c0_132, %c0_133] : memref<32x64xf32, #tpu.memory_space<vmem>>, vector<32x64xf32>
    tpu.vector_store %arg8[%c0_132, %c0_133], %295 {strides = array<i32>} : memref<32x64xf32, #tpu.memory_space<vmem>>, vector<32x64xf32>,
    return
  }
}

</mosaic_0001>

<bundles_post_ra>
// kernel: tpu_custom_call.1
= control target key start
LH: loop header
LB: loop body
LE: loop exit
PB: predicated region body
PF: predicated region fallthrough
CT: control target
= control target key end

     0   :  { %14 = vsyncpa [#allocation3], 0  ;;  %v2836_v1 = vmov 0.0   ;;  %vm2837_vm0 = vmmov 0   ;;  %vm93_vm1 = vcmask 261120   ;;  %s3418_s0 = inlined_call_operand.vmem [shape: f32[16,32], index: 0, kind: input, shape index: {}]   ;;  %s3419_s1 = inlined_call_operand.vmem [shape: f32[64,32], index: 1, kind: input, shape index: {}]   ;;  %s3420_s2 = inlined_call_operand.vmem [shape: f32[12,1,16], index: 2, kind: input, shape index: {}]   ;;  %s3421_s3 = inlined_call_operand.vmem [shape: f32[2,1,64], index: 3, kind: input, shape index: {}]   ;;  %s3422_s4 = inlined_call_operand.vmem [shape: bf16[12,32,16], index: 4, kind: input, shape index: {}]   ;;  %s3423_s5 = inlined_call_operand.vmem [shape: bf16[224,32], index: 5, kind: input, shape index: {}]   ;;  %s3424_s6 = inlined_call_operand.vmem [shape: bf16[2,32,64], index: 6, kind: input, shape index: {}]   ;;  %s3425_s7 = inlined_call_operand.hbm [shape: f32[2,32], index: 7, kind: output, shape index: {0}]   ;;  %s3426_s8 = inlined_call_operand.hbm [shape: f32[32,64], index: 8, kind: output, shape index: {1}]  }
   0x1   :  { %v2698_v0 = vld [vmem:[%s3422_s4] sm:$0xff]   ;;  %2427 = vmatprep.subr.bf16.mxu0 %v2836_v1  ;;  %v2699_v2 = vld [vmem:[%s3422_s4 + $0x8] sm:$0xff]   ;;  %2435 = vmatprep.subr.bf16.mxu1 %v2836_v1  ;;  %v2700_v3 = vld [vmem:[%s3422_s4 + $0x10] sm:$0xff]  }
   0x2   :  { %2428 = vmatpush3.bf16.msra.mxu0 %v2698_v0  ;;  %2431 = vmatprep.mubr.msk.bf16.mxu0 %vm2837_vm0, %v2836_v1  ;;  %v2905_v4 = vld [vmem:[%s3418_s0] sm:$0xff]  ;;  %v2910_v5 = vld [vmem:[%s3418_s0 + $0x8] sm:$0xff]  ;;  %v2702_v7 = vld [vmem:[%s3422_s4 + $0x18] sm:$0xff]  }
   0x3   :  { %2429 = vmatprep.subr.bf16.mxu0 %v2836_v1  ;;  %2439 = vmatprep.mubr.msk.bf16.mxu1 %vm2837_vm0, %v2836_v1  ;;  %v69_v6 = vpack.c.bf16 %v2910_v5, %v2905_v4  ;;  %v2701_v8 = vld [vmem:[%s3422_s4 + $0x20] sm:$0xff]   ;;  %v2704_v9 = vld [vmem:[%s3422_s4 + $0x30] sm:$0xff]   ;;  %v2703_v10 = vld [vmem:[%s3422_s4 + $0x28] sm:$0xff]  }
   0x4   :  { %2436 = vmatpush3.bf16.msra.mxu1 %v2700_v3  ;;  %v2705_v11 = vld [vmem:[%s3422_s4 + $0x38] sm:$0xff]   ;;  %v2706_v12 = vld [vmem:[%s3422_s4 + $0x40] sm:$0xff]  }
   0x5   :  { %2437 = vmatprep.subr.bf16.mxu1 %v2836_v1 }
   0x6   :  { %2430 = vmatpush3.bf16.msra.mxu0 %v2699_v2 }
   0x7   :  { %2443 = vmatprep.subr.bf16.mxu0 %v2836_v1 }
   0x8   :  { %2438 = vmatpush3.bf16.msra.mxu1 %v2702_v7 }
   0x9   :  { %2432 = vmatmul.mubr.msk.bf16.vlgmr.msra.gmra.mrb[0].mxu0 %vm93_vm1, %v69_v6  ;;  %2451 = vmatprep.subr.bf16.mxu1 %v2836_v1 }
   0xa   :  { %2444 = vmatpush3.bf16.msra.mxu0 %v2701_v8  ;;  %2447 = vmatprep.mubr.msk.bf16.mxu0 %vm2837_vm0, %v2836_v1 }
   0xb   :  { %2445 = vmatprep.subr.bf16.mxu0 %v2836_v1  ;;  %2440 = vmatmul.mubr.msk.bf16.vlgmr.msra.gmra.mrb[0].mxu1 %vm93_vm1, %v69_v6 }
   0xc   :  { %2452 = vmatpush3.bf16.msra.mxu1 %v2704_v9  ;;  %2455 = vmatprep.mubr.msk.bf16.mxu1 %vm2837_vm0, %v2836_v1 }
   0xd   :  { %2453 = vmatprep.subr.bf16.mxu1 %v2836_v1 }
   0xe   :  { %2446 = vmatpush3.bf16.msra.mxu0 %v2703_v10 }
   0xf   :  { %2459 = vmatprep.subr.bf16.mxu0 %v2836_v1 }
  0x10   :  { %2454 = vmatpush3.bf16.msra.mxu1 %v2705_v11 }
  0x11   :  { %2448 = vmatmul.mubr.msk.bf16.vlgmr.msra.gmra.mrb[4].mxu0 %vm93_vm1, %v69_v6  ;;  %2467 = vmatprep.subr.bf16.mxu1 %v2836_v1 }
  0x12   :  { %2460 = vmatpush3.bf16.msra.mxu0 %v2706_v12  ;;  %2463 = vmatprep.mubr.msk.bf16.mxu0 %vm2837_vm0, %v2836_v1 }
  0x13   :  { %2456 = vmatmul.mubr.msk.bf16.vlgmr.msra.gmra.mrb[4].mxu1 %vm93_vm1, %v69_v6  ;;  %2461 = vmatprep.subr.bf16.mxu0 %v2836_v1 }
  0x14   :  { %2471 = vmatprep.mubr.msk.bf16.mxu1 %vm2837_vm0, %v2836_v1 }
  0x15   :  { %15 = vsyncpa [#allocation5], 0  ;;  %v2707_v13 = vld [vmem:[%s3422_s4 + $0x48] sm:$0xff]   ;;  %v2708_v14 = vld [vmem:[%s3422_s4 + $0x50] sm:$0xff]   ;;  %vm468_vm2 = vcmask 130048   ;;  %vm969_vm4 = vcmask 523264  }
  0x16   :  { %2462 = vmatpush3.bf16.msra.mxu0 %v2707_v13  ;;  %2468 = vmatpush3.bf16.msra.mxu1 %v2708_v14  ;;  %v2709_v15 = vld [vmem:[%s3422_s4 + $0x58] sm:$0xff]   ;;  %v2171_v16 = vld [vmem:[%s3420_s2] ss:$0 sm:$0xff]  ;;  %v2189_v26 = vld [vmem:[%s3420_s2 + $0x2] ss:$0 sm:$0xff]  ;;  %vm2057_vm5 = vcmask 1040384  }
  0x17   :  { %2469 = vmatprep.subr.bf16.mxu1 %v2836_v1  ;;  %v2198_v28 = vld [vmem:[%s3420_s2 + $0x3] ss:$0 sm:$0xff]  ;;  %vm2978_vm3 = vmpackc.low %vm468_vm2, %vm468_vm2  ;;  %v2180_v43 = vld [vmem:[%s3420_s2 + $0x1] ss:$0 sm:$0xff] }
  0x18   :  { %v2207_v47 = vld [vmem:[%s3420_s2 + $0x4] ss:$0 sm:$0xff]  ;;  %v3010_v57 = vld [vmem:[%s3419_s1 + $0x8] sm:$0xff]  ;;  %v3016_v60 = vld [vmem:[%s3419_s1 + $0x10] sm:$0xff] }
  0x19   :  { %2464 = vmatmul.mubr.msk.bf16.vlgmr.msra.gmra.mrb[8].mxu0 %vm93_vm1, %v69_v6  ;;  %v3005_v55 = vld [vmem:[%s3419_s1] sm:$0xff]  ;;  %v3023_v0 = vld [vmem:[%s3419_s1 + $0x18] sm:$0xff] }
  0x1a   :  { %2470 = vmatpush3.bf16.msra.mxu1 %v2709_v15 }
  0x1d   :  { %2472 = vmatmul.mubr.msk.bf16.vlgmr.msra.gmra.mrb[8].mxu1 %vm93_vm1, %v69_v6 }
  0xdc   :  { %v131_v17 = vpop.f32.mrb[0].mxu0 }
  0xdd   :  { %v132_v18 = vadd.f32 %v2171_v16, %v131_v17  ;;  %v2433_v19 = vpop.f32.mrb[1].mxu0 }
  0xde   :  { %v134_v20 = vpop.f32.mrb[2].mxu0  ;;  %v197_v21 = vpop.f32.mrb[0].mxu1 }
  0xdf   :  { %v2434_v22 = vpop.f32.mrb[3].mxu0  ;;  %2483 = vmatprep.mubr.msk.f32.mxu0 %vm468_vm2, %v132_v18  ;;  %v2441_v23 = vpop.f32.mrb[1].mxu1  ;;  %v135_v44 = vadd.f32 %v2171_v16, %v134_v20  ;;  %v198_v45 = vadd.f32 %v2180_v43, %v197_v21 }
  0xe0   :  { %v200_v24 = vpop.f32.mrb[2].mxu1 }
  0xe1   :  { %v2442_v25 = vpop.f32.mrb[3].mxu1  ;;  %v201_v46 = vadd.f32 %v2180_v43, %v200_v24 }
  0xe4   :  { %v263_v27 = vpop.f32.mrb[4].mxu0 }
  0xe5   :  { %v2449_v29 = vpop.f32.mrb[5].mxu0  ;;  %v264_v32 = vadd.f32 %v2189_v26, %v263_v27 }
  0xe6   :  { %v266_v30 = vpop.f32.mrb[6].mxu0  ;;  %v329_v31 = vpop.f32.mrb[4].mxu1 }
  0xe7   :  { %v267_v33 = vadd.f32 %v2189_v26, %v266_v30  ;;  %v2450_v34 = vpop.f32.mrb[7].mxu0  ;;  %v330_v35 = vadd.f32 %v2198_v28, %v329_v31  ;;  %v2457_v36 = vpop.f32.mrb[5].mxu1 }
  0xe8   :  { %v332_v38 = vpop.f32.mrb[6].mxu1 }
  0xe9   :  { %v2651_v39 = vpack.c.bf16 %v267_v33, %v264_v32  ;;  %v333_v40 = vadd.f32 %v2198_v28, %v332_v38  ;;  %v2458_v41 = vpop.f32.mrb[7].mxu1  ;;  %v2216_v32 = vld [vmem:[%s3420_s2 + $0x5] ss:$0 sm:$0xff] }
  0xeb   :  { %2653 = vmatprep.subr.msk.bf16.mxu0 %vm2978_vm3, %v2651_v39  ;;  %v2657_v42 = vpack.c.bf16 %v333_v40, %v330_v35 }
  0xec   :  { %2656 = vmatpush3.bf16.xpose.msk.msra.mxu0 %vm2978_vm3, %v2651_v39  ;;  %v395_v48 = vpop.f32.mrb[8].mxu0 }
  0xed   :  { %2659 = vmatprep.subr.msk.bf16.mxu0 %vm2978_vm3, %v2657_v42  ;;  %v396_v49 = vadd.f32 %v2207_v47, %v395_v48  ;;  %v2465_v50 = vpop.f32.mrb[9].mxu0 }
  0xee   :  { %v398_v51 = vpop.f32.mrb[10].mxu0 }
  0xef   :  { %v399_v52 = vadd.f32 %v2207_v47, %v398_v51  ;;  %v2466_v53 = vpop.f32.mrb[11].mxu0  ;;  %v2711_v51 = vld [vmem:[%s3423_s5] sm:$0xff]  }
  0xf0   :  { %v461_v30 = vpop.f32.mrb[8].mxu1 }
  0xf1   :  { %v2663_v54 = vpack.c.bf16 %v399_v52, %v396_v49  ;;  %v2473_v31 = vpop.f32.mrb[9].mxu1  ;;  %v462_v33 = vadd.f32 %v2216_v32, %v461_v30  ;;  %v2710_v52 = vld [vmem:[%s3423_s5 + $0x8] sm:$0xff]  }
  0xf2   :  { %v464_v34 = vpop.f32.mrb[10].mxu1 }
  0xf3   :  { %2664 = vmatprep.subr.bf16.mxu1 %v2663_v54  ;;  %v465_v35 = vadd.f32 %v2216_v32, %v464_v34  ;;  %v2474_v36 = vpop.f32.mrb[11].mxu1  ;;  %v2713_v32 = vld [vmem:[%s3424_s6 + $0x8] sm:$0xff]   ;;  %v2715_v34 = vld [vmem:[%s3423_s5 + $0x18] sm:$0xff]  }
  0xf4   :  { %2662 = vmatpush3.bf16.xpose.msk.msra.mxu0 %vm2978_vm3, %v2657_v42  ;;  %2666 = vmatpush3.bf16.msra.mxu1 %v2663_v54 }
  0xf5   :  { %2509 = vmatprep.subr.bf16.mxu0 %v2836_v1  ;;  %v2667_v38 = vpack.c.bf16 %v465_v35, %v462_v33  ;;  %v2714_v33 = vld [vmem:[%s3423_s5 + $0x10] sm:$0xff]  }
  0xf7   :  { %2668 = vmatprep.subr.bf16.mxu1 %v2667_v38 }
  0xf8   :  { %2670 = vmatpush3.bf16.msra.mxu1 %v2667_v38 }
  0xf9   :  { %2503 = vmatprep.subr.bf16.mxu1 %v2836_v1 }
  0xfb   :  { %2484 = vmatmul.mubr.msk.f32.vlgmr.msra.gmra.mrb[12].mxu0 %vm468_vm2, %v135_v44 }
  0xfc   :  { %2486 = vmatprep.mubr.msk.f32.mxu0 %vm468_vm2, %v198_v45  ;;  %2510 = vmatpush3.bf16.msra.mxu0 %v2711_v51 }
  0xfd   :  { %2523 = vmatprep.subr.bf16.mxu0 %v2836_v1 }
  0xff   :  { %2487 = vmatmul.mubr.msk.f32.gmra.mrb[14].mxu0 %vm468_vm2, %v201_v46 }
 0x100   :  { %2511 = vmatprep.mubr.msk.bf16.mxu0 %vm2837_vm0, %v2836_v1 }
 0x1ce   :  { %v2485_v56 = vpop.f32.mrb[12].mxu0 }
 0x1cf   :  { %v559_v58 = vpop.f32.mrb[13].mxu0  ;;  %v565_v61 = vadd.f32 %v2485_v56, %v3010_v57 }
 0x1d0   :  { %v560_v59 = vadd.f32 %v559_v58, %v3005_v55 }
 0x1d1   :  { %v581_v8 = vsel %vm93_vm1, %v565_v61, -inf }
 0x1d2   :  { %v2488_v62 = vpop.f32.mrb[14].mxu0  ;;  %v578_v63 = vsel %vm93_vm1, %v560_v59, -inf }
 0x1d3   :  { %v569_v2 = vpop.f32.mrb[15].mxu0  ;;  %579 = vmax.xlane.f32.xlu0 %v578_v63  ;;  %v575_v6 = vadd.f32 %v2488_v62, %v3023_v0  ;;  %v821_v62 = vlaneseq }
 0x1d4   :  { %v570_v3 = vadd.f32 %v569_v2, %v3016_v60 }
 0x1d5   :  { %v587_v9 = vsel %vm93_vm1, %v575_v6, -inf  ;;  %v3070_v63 = vshrl.u32 %v821_v62, 7 }
 0x1d6   :  { %v584_v7 = vsel %vm93_vm1, %v570_v3, -inf }
 0x1d7   :  { %585 = vmax.xlane.f32.xlu1 %v584_v7  ;;  %582 = vmax.xlane.f32.xlu0 %v581_v8  ;;  %v823_v2 = vsub.s32 0, %v3070_v63 }
 0x1db   :  { %588 = vmax.xlane.f32.xlu1 %v587_v9 }
 0x260   :  { %v580_v10 = vpop.xlane.xlu0 %579 }
 0x261   :  { %v590_v11 = vsub.f32 %v560_v59, %v580_v10 }
 0x263   :  { %v594_v12 = vmul.f32 1.442695, %v590_v11 }
 0x264   :  { %v586_v13 = vpop.xlane.xlu1 %585  ;;  %v583_v14 = vpop.xlane.xlu0 %582 }
 0x265   :  { %2740 = vpow2.f32 %v594_v12  ;;  %v592_v15 = vsub.f32 %v570_v3, %v586_v13  ;;  %v591_v16 = vsub.f32 %v565_v61, %v583_v14 }
 0x267   :  { %v598_v17 = vmul.f32 1.442695, %v592_v15  ;;  %v596_v18 = vmul.f32 1.442695, %v591_v16 }
 0x268   :  { %v589_v19 = vpop.xlane.xlu1 %588 }
 0x269   :  { %2742 = vpow2.f32 %v598_v17  ;;  %v593_v20 = vsub.f32 %v575_v6, %v589_v19  ;;  %v3076_v6 = vld [vmem:[%s3419_s1 + $0x30] sm:$0xff] }
 0x26a   :  { %2744 = vpow2.f32 %v596_v18  ;;  %v824_v10 = vrot.slane %v3076_v6, %v823_v2 }
 0x26b   :  { %v600_v21 = vmul.f32 1.442695, %v593_v20 }
 0x26d   :  { %2746 = vpow2.f32 %v600_v21 }
 0x26f   :  { %v2741_v22 = vpop.eup %2740 }
 0x270   :  { %v602_v23 = vsel %vm93_vm1, %v2741_v22, 0.0 }
 0x271   :  { %603 = vadd.xlane.f32.xlu0 %v602_v23 }
 0x273   :  { %v2743_v24 = vpop.eup %2742 }
 0x274   :  { %v2745_v25 = vpop.eup %2744  ;;  %v608_v26 = vsel %vm93_vm1, %v2743_v24, 0.0 }
 0x275   :  { %609 = vadd.xlane.f32.xlu0 %v608_v26  ;;  %v605_v27 = vsel %vm93_vm1, %v2745_v25, 0.0 }
 0x276   :  { %606 = vadd.xlane.f32.xlu1 %v605_v27 }
 0x277   :  { %v2747_v28 = vpop.eup %2746 }
 0x278   :  { %v611_v29 = vsel %vm93_vm1, %v2747_v28, 0.0 }
 0x27a   :  { %612 = vadd.xlane.f32.xlu1 %v611_v29 }
 0x2fe   :  { %v604_v39 = vpop.xlane.xlu0 %603 }
 0x2ff   :  { %2748 = vrcp.f32 %v604_v39 }
 0x302   :  { %v610_v40 = vpop.xlane.xlu0 %609 }
 0x303   :  { %v607_v41 = vpop.xlane.xlu1 %606  ;;  %2750 = vrcp.f32 %v610_v40 }
 0x304   :  { %2752 = vrcp.f32 %v607_v41 }
 0x307   :  { %v613_v42 = vpop.xlane.xlu1 %612 }
 0x308   :  { %2754 = vrcp.f32 %v613_v42  ;;  %v858_v42 = vsub.s32 1, %v3070_v63 }
 0x309   :  { %v2749_v43 = vpop.eup %2748 }
 0x30a   :  { %v3038_v44 = vmul.f32 %v2749_v43, %v2741_v22  ;;  %v864_v43 = vsub.s32 2, %v3070_v63 }
 0x30c   :  { %2497 = vmatprep.mubr.msk.f32.mxu1 %vm93_vm1, %v3038_v44  ;;  %v865_v51 = vrot.slane %v3076_v6, %v864_v43 }
 0x30d   :  { %v2751_v45 = vpop.eup %2750 }
 0x30e   :  { %v2753_v46 = vpop.eup %2752  ;;  %v3042_v47 = vmul.f32 %v2751_v45, %v2743_v24  ;;  %v859_v45 = vrot.slane %v3076_v6, %v858_v42 }
 0x30f   :  { %v3044_v48 = vmul.f32 %v2753_v46, %v2745_v25 }
 0x311   :  { %2498 = vmatmul.mubr.msk.f32.vlgmr.msra.gmra.mrb[12].mxu1 %vm93_vm1, %v3044_v48 }
 0x312   :  { %v2755_v49 = vpop.eup %2754  ;;  %2500 = vmatprep.mubr.msk.f32.mxu1 %vm93_vm1, %v3042_v47  ;;  %2504 = vmatpush3.bf16.msra.mxu1 %v2710_v52 }
 0x313   :  { %v3050_v50 = vmul.f32 %v2755_v49, %v2747_v28  ;;  %2515 = vmatprep.subr.bf16.mxu1 %v2836_v1 }
 0x315   :  { %2501 = vmatmul.mubr.msk.f32.gmra.mrb[14].mxu1 %vm93_vm1, %v3050_v50 }
 0x316   :  { %2505 = vmatprep.mubr.msk.bf16.mxu1 %vm2837_vm0, %v2836_v1 }
 0x3e4   :  { %v2499_v53 = vpop.f32.mrb[12].mxu1 }
 0x3e5   :  { %v700_v54 = vpop.f32.mrb[13].mxu1 }
 0x3e6   :  { %v719_v56 = vpack.c.bf16 %v2499_v53, %v700_v54 }
 0x3e8   :  { %v2502_v58 = vpop.f32.mrb[14].mxu1  ;;  %2512 = vmatmul.mubr.msk.bf16.vlgmr.msra.gmra.mrb[16].mxu0 %vm468_vm2, %v719_v56 }
 0x3e9   :  { %v710_v59 = vpop.f32.mrb[15].mxu1  ;;  %2531 = vmatprep.mubr.msk.bf16.mxu0 %vm2837_vm0, %v2836_v1  ;;  %2524 = vmatpush3.bf16.msra.mxu0 %v2714_v33 }
 0x3ea   :  { %v720_v61 = vpack.c.bf16 %v2502_v58, %v710_v59  ;;  %2525 = vmatprep.subr.bf16.mxu0 %v2836_v1  ;;  %v3114_v59 = vld [vmem:[%s3419_s1 + $0x20] sm:$0xff] }
 0x3ec   :  { %2506 = vmatmul.mubr.msk.bf16.vlgmr.msra.gmra.mrb[16].mxu1 %vm468_vm2, %v720_v61  ;;  %v3119_v61 = vld [vmem:[%s3419_s1 + $0x28] sm:$0xff] }
 0x3ed   :  { %2519 = vmatprep.mubr.msk.bf16.mxu1 %vm2837_vm0, %v2836_v1  ;;  %2526 = vmatpush3.bf16.msra.mxu0 %v2715_v34 }
 0x3ee   :  { %2527 = vmatprep.subr.bf16.mxu0 %v2836_v1 }
 0x4bb   :  { %v814_v3 = vpop.f32.mrb[16].mxu0 }
 0x4bc   :  { %v2513_v7 = vpop.f32.mrb[17].mxu0 }
 0x4bd   :  { %v817_v8 = vpop.f32.mrb[18].mxu0 }
 0x4be   :  { %v2514_v9 = vpop.f32.mrb[19].mxu0 }
 0x4bf   :  { %v764_v11 = vpop.f32.mrb[16].mxu1  ;;  %v2716_v9 = vld [vmem:[%s3423_s5 + $0x20] sm:$0xff]  }
 0x4c0   :  { %v815_v12 = vadd.f32 %v814_v3, %v764_v11  ;;  %v2507_v13 = vpop.f32.mrb[17].mxu1  ;;  %2528 = vmatpush3.bf16.msra.mxu0 %v2716_v9  ;;  %v2236_v11 = vld [vmem:[%s3421_s3] ss:$0 sm:$0xff] }
 0x4c1   :  { %v767_v14 = vpop.f32.mrb[18].mxu1  ;;  %2529 = vmatprep.subr.bf16.mxu0 %v2836_v1 }
 0x4c2   :  { %v825_v15 = vadd.f32 %v824_v10, %v815_v12  ;;  %v818_v16 = vadd.f32 %v817_v8, %v767_v14  ;;  %v2508_v17 = vpop.f32.mrb[19].mxu1 }
 0x4c4   :  { %v826_v18 = vadd.f32 %v824_v10, %v818_v16  ;;  %v827_v19 = vadd.f32 %v825_v15, %v2905_v4  ;;  %v2717_v10 = vld [vmem:[%s3423_s5 + $0x28] sm:$0xff]  }
 0x4c5   :  { %2530 = vmatpush3.bf16.msra.mxu0 %v2717_v10 }
 0x4c6   :  { %v829_v20 = vsel %vm93_vm1, %v827_v19, 0.0  ;;  %v828_v21 = vadd.f32 %v826_v18, %v2910_v5  ;;  %v2712_v5 = vld [vmem:[%s3424_s6] sm:$0xff]   ;;  %2551 = vmatprep.subr.bf16.mxu0 %v2836_v1 }
 0x4c7   :  { %830 = vadd.xlane.f32.xlu0 %v829_v20  ;;  %2516 = vmatpush3.bf16.msra.mxu1 %v2712_v5 }
 0x4c8   :  { %v832_v22 = vsel %vm93_vm1, %v828_v21, 0.0  ;;  %2517 = vmatprep.subr.bf16.mxu1 %v2836_v1 }
 0x4c9   :  { %833 = vadd.xlane.f32.xlu1 %v832_v22 }
 0x4cb   :  { %2518 = vmatpush3.bf16.msra.mxu1 %v2713_v32 }
 0x4cc   :  { %2535 = vmatprep.subr.bf16.mxu1 %v2836_v1 }
 0x554   :  { %v831_v23 = vpop.xlane.xlu0 %830 }
 0x555   :  { %v836_v24 = vmul.f32 0.03125, %v831_v23 }
 0x556   :  { %v834_v25 = vpop.xlane.xlu1 %833 }
 0x557   :  { %v838_v26 = vsub.f32 %v827_v19, %v836_v24  ;;  %v837_v27 = vmul.f32 0.03125, %v834_v25 }
 0x559   :  { %v839_v28 = vsub.f32 %v828_v21, %v837_v27  ;;  %v840_v29 = vmul.f32 %v838_v26, %v838_v26  ;;  %v943_v21 = vsub.s32 3, %v3070_v63 }
 0x55b   :  { %v842_v30 = vsel %vm93_vm1, %v840_v29, 0.0  ;;  %v841_v31 = vmul.f32 %v839_v28, %v839_v28  ;;  %v944_v22 = vrot.slane %v3076_v6, %v943_v21 }
 0x55c   :  { %843 = vadd.xlane.f32.xlu0 %v842_v30 }
 0x55d   :  { %v845_v4 = vsel %vm93_vm1, %v841_v31, 0.0 }
 0x55e   :  { %846 = vadd.xlane.f32.xlu1 %v845_v4 }
 0x5e9   :  { %v844_v35 = vpop.xlane.xlu0 %843 }
 0x5ea   :  { %v848_v36 = vmul.f32 0.03125, %v844_v35 }
 0x5eb   :  { %v847_v38 = vpop.xlane.xlu1 %846 }
 0x5ec   :  { %v850_v39 = vadd.f32 1e-05, %v848_v36  ;;  %v849_v40 = vmul.f32 0.03125, %v847_v38 }
 0x5ee   :  { %2756 = vrsqrt.f32 %v850_v39  ;;  %v851_v41 = vadd.f32 1e-05, %v849_v40 }
 0x5f0   :  { %2758 = vrsqrt.f32 %v851_v41 }
 0x5f8   :  { %v2757_v46 = vpop.eup %2756 }
 0x5f9   :  { %v854_v49 = vmul.f32 %v2757_v46, %v838_v26  ;;  %v2719_v46 = vld [vmem:[%s3422_s4 + $0x80] sm:$0xff]  }
 0x5fa   :  { %v2759_v52 = vpop.eup %2758 }
 0x5fb   :  { %v860_v53 = vmul.f32 %v859_v45, %v854_v49  ;;  %v855_v54 = vmul.f32 %v2759_v52, %v839_v28  ;;  %v2720_v49 = vld [vmem:[%s3422_s4 + $0x68] sm:$0xff]  }
 0x5fd   :  { %v861_v56 = vmul.f32 %v859_v45, %v855_v54  ;;  %v866_v58 = vadd.f32 %v865_v51, %v860_v53  ;;  %v2718_v45 = vld [vmem:[%s3422_s4 + $0x60] sm:$0xff]  }
 0x5ff   :  { %v867_v62 = vadd.f32 %v865_v51, %v861_v56  ;;  %v868_v3 = vmul.f32 %v866_v58, %v3114_v59  ;;  %v2721_v51 = vld [vmem:[%s3422_s4 + $0x88] sm:$0xff]  }
 0x601   :  { %v869_v7 = vmul.f32 %v867_v62, %v3119_v61 }
 0x603   :  { %v870_v8 = vpack.c.bf16 %v869_v7, %v868_v3 }
 0x605   :  { %2520 = vmatmul.mubr.msk.bf16.vlgmr.msra.gmra.mrb[20].mxu1 %vm93_vm1, %v870_v8 }
 0x606   :  { %2539 = vmatprep.mubr.msk.bf16.mxu1 %vm2837_vm0, %v2836_v1  ;;  %2536 = vmatpush3.bf16.msra.mxu1 %v2718_v45 }
 0x607   :  { %2537 = vmatprep.subr.bf16.mxu1 %v2836_v1 }
 0x60a   :  { %2538 = vmatpush3.bf16.msra.mxu1 %v2720_v49  ;;  %v2286_v49 = vld [vmem:[%s3420_s2 + $0xa] ss:$0 sm:$0xff] }
 0x60b   :  { %2543 = vmatprep.subr.bf16.mxu1 %v2836_v1 }
 0x6d8   :  { %v931_v12 = vpop.f32.mrb[20].mxu1 }
 0x6d9   :  { %v932_v13 = vadd.f32 %v2236_v11, %v931_v12  ;;  %v2521_v14 = vpop.f32.mrb[21].mxu1 }
 0x6da   :  { %v934_v15 = vpop.f32.mrb[22].mxu1 }
 0x6db   :  { %v935_v16 = vadd.f32 %v2236_v11, %v934_v15  ;;  %v2522_v17 = vpop.f32.mrb[23].mxu1  ;;  %v938_v18 = vmax.f32 %v932_v13, 0.0 }
 0x6dd   :  { %v939_v19 = vmax.f32 %v935_v16, 0.0 }
 0x6df   :  { %v940_v20 = vpack.c.bf16 %v939_v19, %v938_v18 }
 0x6e1   :  { %2532 = vmatmul.mubr.msk.bf16.vlgmr.msra.gmra.mrb[20].mxu0 %vm969_vm4, %v940_v20  ;;  %v2722_v20 = vld [vmem:[%s3422_s4 + $0x70] sm:$0xff]  }
 0x6e2   :  { %2555 = vmatprep.mubr.msk.bf16.mxu0 %vm2837_vm0, %v2836_v1  ;;  %2552 = vmatpush3.bf16.msra.mxu0 %v2719_v46 }
 0x6e3   :  { %2553 = vmatprep.subr.bf16.mxu0 %v2836_v1 }
 0x6e6   :  { %2554 = vmatpush3.bf16.msra.mxu0 %v2721_v51 }
 0x6e7   :  { %2567 = vmatprep.subr.bf16.mxu0 %v2836_v1 }
 0x7b4   :  { %v1007_v23 = vpop.f32.mrb[20].mxu0 }
 0x7b5   :  { %v1008_v24 = vadd.f32 %v1007_v23, %v944_v22  ;;  %v2533_v25 = vpop.f32.mrb[21].mxu0 }
 0x7b6   :  { %v1010_v26 = vpop.f32.mrb[22].mxu0  ;;  %v2725_v25 = vld [vmem:[%s3422_s4 + $0xa8] sm:$0xff]  }
 0x7b7   :  { %v1011_v27 = vadd.f32 %v1010_v26, %v944_v22  ;;  %v2534_v28 = vpop.f32.mrb[23].mxu0  ;;  %v1014_v29 = vadd.f32 %v1008_v24, %v868_v3  ;;  %v1044_v3 = vsub.s32 4, %v3070_v63  ;;  %v2723_v22 = vld [vmem:[%s3422_s4 + $0xa0] sm:$0xff]   ;;  %v2724_v24 = vld [vmem:[%s3422_s4 + $0x78] sm:$0xff]   ;;  %v2726_v26 = vld [vmem:[%s3422_s4 + $0x90] sm:$0xff]  }
 0x7b8   :  { %v2728_v28 = vld [vmem:[%s3422_s4 + $0xb0] sm:$0xff]  }
 0x7b9   :  { %v1016_v30 = vsel %vm93_vm1, %v1014_v29, 0.0  ;;  %v1015_v31 = vadd.f32 %v1011_v27, %v869_v7  ;;  %v1050_v7 = vsub.s32 5, %v3070_v63  ;;  %v1045_v8 = vrot.slane %v3076_v6, %v1044_v3  ;;  %v2727_v27 = vld [vmem:[%s3422_s4 + $0x98] sm:$0xff]  }
 0x7ba   :  { %1017 = vadd.xlane.f32.xlu0 %v1016_v30  ;;  %v2250_v30 = vld [vmem:[%s3420_s2 + $0x6] ss:$0 sm:$0xff] }
 0x7bb   :  { %v1019_v4 = vsel %vm93_vm1, %v1015_v31, 0.0  ;;  %v1051_v10 = vrot.slane %v3076_v6, %v1050_v7 }
 0x7bc   :  { %1020 = vadd.xlane.f32.xlu1 %v1019_v4  ;;  %v2268_v4 = vld [vmem:[%s3420_s2 + $0x8] ss:$0 sm:$0xff] }
 0x847   :  { %v1018_v5 = vpop.xlane.xlu0 %1017 }
 0x848   :  { %v1022_v32 = vmul.f32 0.03125, %v1018_v5 }
 0x849   :  { %v1021_v33 = vpop.xlane.xlu1 %1020 }
 0x84a   :  { %v1024_v34 = vsub.f32 %v1014_v29, %v1022_v32  ;;  %v1023_v35 = vmul.f32 0.03125, %v1021_v33  ;;  %v2729_v29 = vld [vmem:[%s3422_s4 + $0xb8] sm:$0xff]  }
 0x84c   :  { %v1025_v36 = vsub.f32 %v1015_v31, %v1023_v35  ;;  %v1026_v38 = vmul.f32 %v1024_v34, %v1024_v34 }
 0x84e   :  { %v1028_v39 = vsel %vm93_vm1, %v1026_v38, 0.0  ;;  %v1027_v40 = vmul.f32 %v1025_v36, %v1025_v36 }
 0x84f   :  { %1029 = vadd.xlane.f32.xlu0 %v1028_v39 }
 0x850   :  { %v1031_v41 = vsel %vm93_vm1, %v1027_v40, 0.0 }
 0x851   :  { %1032 = vadd.xlane.f32.xlu1 %v1031_v41 }
 0x8dc   :  { %v1030_v52 = vpop.xlane.xlu0 %1029 }
 0x8dd   :  { %v1034_v53 = vmul.f32 0.03125, %v1030_v52 }
 0x8de   :  { %v1033_v54 = vpop.xlane.xlu1 %1032 }
 0x8df   :  { %v1036_v56 = vadd.f32 1e-05, %v1034_v53  ;;  %v1035_v58 = vmul.f32 0.03125, %v1033_v54 }
 0x8e1   :  { %2760 = vrsqrt.f32 %v1036_v56  ;;  %v1037_v62 = vadd.f32 1e-05, %v1035_v58 }
 0x8e3   :  { %2762 = vrsqrt.f32 %v1037_v62 }
 0x8eb   :  { %v2761_v9 = vpop.eup %2760 }
 0x8ec   :  { %v1040_v11 = vmul.f32 %v2761_v9, %v1024_v34 }
 0x8ed   :  { %v2763_v12 = vpop.eup %2762 }
 0x8ee   :  { %v1046_v13 = vmul.f32 %v1045_v8, %v1040_v11  ;;  %v1041_v14 = vmul.f32 %v2763_v12, %v1025_v36 }
 0x8f0   :  { %v1052_v15 = vadd.f32 %v1051_v10, %v1046_v13  ;;  %v1047_v16 = vmul.f32 %v1045_v8, %v1041_v14 }
 0x8f2   :  { %v1053_v17 = vadd.f32 %v1051_v10, %v1047_v16  ;;  %v3171_v18 = vmul.f32 %v1052_v15, %v3114_v59  ;;  %v2277_v10 = vld [vmem:[%s3420_s2 + $0x9] ss:$0 sm:$0xff] }
 0x8f4   :  { %v3174_v19 = vmul.f32 %v1053_v17, %v3119_v61 }
 0x8f6   :  { %v1056_v23 = vpack.c.bf16 %v3174_v19, %v3171_v18 }
 0x8f8   :  { %2540 = vmatmul.mubr.msk.bf16.vlgmr.msra.gmra.mrb[24].mxu1 %vm93_vm1, %v1056_v23  ;;  %2556 = vmatmul.mubr.msk.bf16.vlgmr.msra.gmra.mrb[24].mxu0 %vm93_vm1, %v1056_v23 }
 0x8f9   :  { %2544 = vmatpush3.bf16.msra.mxu1 %v2722_v20  ;;  %2568 = vmatpush3.bf16.msra.mxu0 %v2723_v22  ;;  %v2295_v20 = vld [vmem:[%s3420_s2 + $0xb] ss:$0 sm:$0xff] }
 0x8fa   :  { %2545 = vmatprep.subr.bf16.mxu1 %v2836_v1  ;;  %2569 = vmatprep.subr.bf16.mxu0 %v2836_v1 }
 0x8fb   :  { %2547 = vmatprep.mubr.msk.bf16.mxu1 %vm2837_vm0, %v2836_v1  ;;  %2571 = vmatprep.mubr.msk.bf16.mxu0 %vm2837_vm0, %v2836_v1 }
 0x8fd   :  { %2546 = vmatpush3.bf16.msra.mxu1 %v2724_v24  ;;  %2570 = vmatpush3.bf16.msra.mxu0 %v2725_v25  ;;  %v2259_v25 = vld [vmem:[%s3420_s2 + $0x7] ss:$0 sm:$0xff] }
 0x8fe   :  { %2559 = vmatprep.subr.bf16.mxu1 %v2836_v1 }
 0x900   :  { %2548 = vmatmul.mubr.msk.bf16.vlgmr.msra.gmra.mrb[28].mxu1 %vm93_vm1, %v1056_v23  ;;  %2572 = vmatmul.mubr.msk.bf16.vlgmr.msra.gmra.mrb[28].mxu0 %vm93_vm1, %v1056_v23 }
 0x901   :  { %2560 = vmatpush3.bf16.msra.mxu1 %v2726_v26  ;;  %2563 = vmatprep.mubr.msk.bf16.mxu1 %vm2837_vm0, %v2836_v1 }
 0x902   :  { %2561 = vmatprep.subr.bf16.mxu1 %v2836_v1 }
 0x905   :  { %2562 = vmatpush3.bf16.msra.mxu1 %v2727_v27 }
 0x906   :  { %2575 = vmatprep.subr.bf16.mxu1 %v2836_v1 }
 0x908   :  { %2564 = vmatmul.mubr.msk.bf16.vlgmr.msra.gmra.mrb[32].mxu1 %vm93_vm1, %v1056_v23 }
 0x909   :  { %2576 = vmatpush3.bf16.msra.mxu1 %v2728_v28  ;;  %2579 = vmatprep.mubr.msk.bf16.mxu1 %vm2837_vm0, %v2836_v1 }
 0x90a   :  { %2577 = vmatprep.subr.bf16.mxu1 %v2836_v1 }
 0x90d   :  { %2578 = vmatpush3.bf16.msra.mxu1 %v2729_v29 }
 0x910   :  { %2580 = vmatmul.mubr.msk.bf16.vlgmr.msra.gmra.mrb[36].mxu1 %vm93_vm1, %v1056_v23 }
 0x9cb   :  { %v1119_v31 = vpop.f32.mrb[24].mxu1  ;;  %v1251_v5 = vpop.f32.mrb[24].mxu0 }
 0x9cc   :  { %v1120_v32 = vadd.f32 %v2250_v30, %v1119_v31  ;;  %v2541_v33 = vpop.f32.mrb[25].mxu1  ;;  %v2557_v34 = vpop.f32.mrb[25].mxu0  ;;  %v1252_v38 = vadd.f32 %v2268_v4, %v1251_v5 }
 0x9cd   :  { %v1122_v35 = vpop.f32.mrb[26].mxu1  ;;  %v1254_v36 = vpop.f32.mrb[26].mxu0 }
 0x9ce   :  { %v1255_v39 = vadd.f32 %v2268_v4, %v1254_v36  ;;  %v2542_v40 = vpop.f32.mrb[27].mxu1  ;;  %v2558_v41 = vpop.f32.mrb[27].mxu0  ;;  %2591 = vmatprep.mubr.msk.f32.mxu0 %vm468_vm2, %v1120_v32  ;;  %v1123_v29 = vadd.f32 %v2250_v30, %v1122_v35 }
 0x9d0   :  { %v2671_v45 = vpack.c.bf16 %v1255_v39, %v1252_v38 }
 0x9d2   :  { %2673 = vmatprep.subr.msk.bf16.mxu0 %vm2978_vm3, %v2671_v45 }
 0x9d3   :  { %v1185_v46 = vpop.f32.mrb[28].mxu1  ;;  %v1383_v51 = vpop.f32.mrb[28].mxu0  ;;  %2676 = vmatpush3.bf16.xpose.msk.msra.mxu0 %vm2978_vm3, %v2671_v45 }
 0x9d4   :  { %v2549_v52 = vpop.f32.mrb[29].mxu1  ;;  %v2573_v53 = vpop.f32.mrb[29].mxu0  ;;  %v1384_v58 = vadd.f32 %v2286_v49, %v1383_v51  ;;  %v1186_v4 = vadd.f32 %v2259_v25, %v1185_v46 }
 0x9d5   :  { %v1188_v54 = vpop.f32.mrb[30].mxu1  ;;  %v1386_v56 = vpop.f32.mrb[30].mxu0 }
 0x9d6   :  { %v1387_v62 = vadd.f32 %v2286_v49, %v1386_v56  ;;  %v2550_v7 = vpop.f32.mrb[31].mxu1  ;;  %v2574_v8 = vpop.f32.mrb[31].mxu0  ;;  %v1189_v37 = vadd.f32 %v2259_v25, %v1188_v54 }
 0x9d8   :  { %v2683_v9 = vpack.c.bf16 %v1387_v62, %v1384_v58 }
 0x9da   :  { %2684 = vmatprep.subr.bf16.mxu1 %v2683_v9 }
 0x9db   :  { %v1317_v11 = vpop.f32.mrb[32].mxu1  ;;  %2686 = vmatpush3.bf16.msra.mxu1 %v2683_v9 }
 0x9dc   :  { %v2565_v12 = vpop.f32.mrb[33].mxu1  ;;  %v1318_v14 = vadd.f32 %v2277_v10, %v1317_v11 }
 0x9dd   :  { %v1320_v13 = vpop.f32.mrb[34].mxu1 }
 0x9de   :  { %v1321_v15 = vadd.f32 %v2277_v10, %v1320_v13  ;;  %v2566_v16 = vpop.f32.mrb[35].mxu1 }
 0x9e0   :  { %v2677_v17 = vpack.c.bf16 %v1321_v15, %v1318_v14 }
 0x9e2   :  { %2679 = vmatprep.subr.msk.bf16.mxu0 %vm2978_vm3, %v2677_v17 }
 0x9e3   :  { %v1449_v22 = vpop.f32.mrb[36].mxu1  ;;  %2682 = vmatpush3.bf16.xpose.msk.msra.mxu0 %vm2978_vm3, %v2677_v17 }
 0x9e4   :  { %v2581_v23 = vpop.f32.mrb[37].mxu1  ;;  %2617 = vmatprep.subr.bf16.mxu0 %v2836_v1  ;;  %v1450_v26 = vadd.f32 %v2295_v20, %v1449_v22 }
 0x9e5   :  { %v1452_v24 = vpop.f32.mrb[38].mxu1 }
 0x9e6   :  { %v1453_v27 = vadd.f32 %v2295_v20, %v1452_v24  ;;  %v2582_v28 = vpop.f32.mrb[39].mxu1 }
 0x9e8   :  { %v2687_v31 = vpack.c.bf16 %v1453_v27, %v1450_v26 }
 0x9ea   :  { %2592 = vmatmul.mubr.msk.f32.vlgmr.msra.gmra.mrb[32].mxu0 %vm468_vm2, %v1123_v29  ;;  %2688 = vmatprep.subr.bf16.mxu1 %v2687_v31  ;;  %v2731_v29 = vld [vmem:[%s3423_s5 + $0x30] sm:$0xff]  }
 0x9eb   :  { %2594 = vmatprep.mubr.msk.f32.mxu0 %vm468_vm2, %v1186_v4  ;;  %2690 = vmatpush3.bf16.msra.mxu1 %v2687_v31  ;;  %v2730_v31 = vld [vmem:[%s3423_s5 + $0x38] sm:$0xff]  }
 0x9ec   :  { %2611 = vmatprep.subr.bf16.mxu1 %v2836_v1  ;;  %2618 = vmatpush3.bf16.msra.mxu0 %v2731_v29  ;;  %v1844_v29 = vsub.s32 7, %v3070_v63 }
 0x9ed   :  { %2631 = vmatprep.subr.bf16.mxu0 %v2836_v1 }
 0x9ee   :  { %2595 = vmatmul.mubr.msk.f32.gmra.mrb[34].mxu0 %vm468_vm2, %v1189_v37 }
 0x9ef   :  { %2619 = vmatprep.mubr.msk.bf16.mxu0 %vm2837_vm0, %v2836_v1 }
 0xabd   :  { %v2593_v5 = vpop.f32.mrb[32].mxu0 }
 0xabe   :  { %v1552_v32 = vadd.f32 %v2593_v5, %v3010_v57  ;;  %v1546_v30 = vpop.f32.mrb[33].mxu0 }
 0xabf   :  { %v1547_v33 = vadd.f32 %v1546_v30, %v3005_v55 }
 0xac0   :  { %v1568_v34 = vsel %vm93_vm1, %v1552_v32, -inf }
 0xac1   :  { %1569 = vmax.xlane.f32.xlu1 %v1568_v34  ;;  %v2596_v35 = vpop.f32.mrb[34].mxu0  ;;  %v1565_v36 = vsel %vm93_vm1, %v1547_v33, -inf  ;;  %v1810_v34 = vsub.s32 6, %v3070_v63 }
 0xac2   :  { %v1562_v38 = vadd.f32 %v2596_v35, %v3023_v0  ;;  %v1556_v39 = vpop.f32.mrb[35].mxu0  ;;  %1566 = vmax.xlane.f32.xlu0 %v1565_v36 }
 0xac3   :  { %v1557_v40 = vadd.f32 %v1556_v39, %v3016_v60 }
 0xac4   :  { %v1574_v41 = vsel %vm93_vm1, %v1562_v38, -inf }
 0xac5   :  { %1575 = vmax.xlane.f32.xlu1 %v1574_v41  ;;  %v1571_v57 = vsel %vm93_vm1, %v1557_v40, -inf }
 0xac6   :  { %1572 = vmax.xlane.f32.xlu0 %v1571_v57 }
 0xb4e   :  { %v1570_v45 = vpop.xlane.xlu1 %1569 }
 0xb4f   :  { %v1578_v55 = vsub.f32 %v1552_v32, %v1570_v45  ;;  %v1567_v46 = vpop.xlane.xlu0 %1566 }
 0xb50   :  { %v1577_v49 = vsub.f32 %v1547_v33, %v1567_v46 }
 0xb51   :  { %v1583_v51 = vmul.f32 1.442695, %v1578_v55 }
 0xb52   :  { %v1581_v52 = vmul.f32 1.442695, %v1577_v49  ;;  %v1576_v53 = vpop.xlane.xlu1 %1575 }
 0xb53   :  { %2764 = vpow2.f32 %v1583_v51  ;;  %v1580_v54 = vsub.f32 %v1562_v38, %v1576_v53  ;;  %v1573_v0 = vpop.xlane.xlu0 %1572 }
 0xb54   :  { %2766 = vpow2.f32 %v1581_v52  ;;  %v1579_v56 = vsub.f32 %v1557_v40, %v1573_v0  ;;  %v1811_v40 = vrot.slane %v3076_v6, %v1810_v34 }
 0xb55   :  { %v1587_v58 = vmul.f32 1.442695, %v1580_v54 }
 0xb56   :  { %v1585_v60 = vmul.f32 1.442695, %v1579_v56 }
 0xb57   :  { %2768 = vpow2.f32 %v1587_v58 }
 0xb58   :  { %2770 = vpow2.f32 %v1585_v60 }
 0xb5d   :  { %v2765_v62 = vpop.eup %2764 }
 0xb5e   :  { %v2767_v7 = vpop.eup %2766  ;;  %v1592_v8 = vsel %vm93_vm1, %v2765_v62, 0.0 }
 0xb5f   :  { %1593 = vadd.xlane.f32.xlu1 %v1592_v8  ;;  %v1589_v9 = vsel %vm93_vm1, %v2767_v7, 0.0 }
 0xb60   :  { %1590 = vadd.xlane.f32.xlu0 %v1589_v9 }
 0xb61   :  { %v2769_v10 = vpop.eup %2768 }
 0xb62   :  { %v2771_v11 = vpop.eup %2770  ;;  %v1598_v12 = vsel %vm93_vm1, %v2769_v10, 0.0 }
 0xb63   :  { %1599 = vadd.xlane.f32.xlu1 %v1598_v12  ;;  %v1595_v13 = vsel %vm93_vm1, %v2771_v11, 0.0 }
 0xb64   :  { %1596 = vadd.xlane.f32.xlu0 %v1595_v13  ;;  %v2733_v13 = vld [vmem:[%s3424_s6 + $0x18] sm:$0xff]  }
 0xbec   :  { %v1594_v14 = vpop.xlane.xlu1 %1593 }
 0xbed   :  { %2772 = vrcp.f32 %v1594_v14  ;;  %v1591_v15 = vpop.xlane.xlu0 %1590  ;;  %v2734_v14 = vld [vmem:[%s3423_s5 + $0x40] sm:$0xff]  }
 0xbee   :  { %2774 = vrcp.f32 %v1591_v15  ;;  %v2735_v15 = vld [vmem:[%s3423_s5 + $0x48] sm:$0xff]  }
 0xbf0   :  { %v1600_v16 = vpop.xlane.xlu1 %1599 }
 0xbf1   :  { %2776 = vrcp.f32 %v1600_v16  ;;  %v1597_v17 = vpop.xlane.xlu0 %1596 }
 0xbf2   :  { %2778 = vrcp.f32 %v1597_v17 }
 0xbf7   :  { %v2773_v20 = vpop.eup %2772 }
 0xbf8   :  { %v2775_v22 = vpop.eup %2774  ;;  %v3270_v24 = vmul.f32 %v2773_v20, %v2765_v62 }
 0xbf9   :  { %v3268_v23 = vmul.f32 %v2775_v22, %v2767_v7 }
 0xbfb   :  { %v2777_v25 = vpop.eup %2776  ;;  %2605 = vmatprep.mubr.msk.f32.mxu1 %vm93_vm1, %v3268_v23 }
 0xbfc   :  { %v2779_v26 = vpop.eup %2778  ;;  %2606 = vmatmul.mubr.msk.f32.vlgmr.msra.gmra.mrb[40].mxu1 %vm93_vm1, %v3270_v24  ;;  %v3278_v28 = vmul.f32 %v2777_v25, %v2769_v10 }
 0xbfd   :  { %v3276_v27 = vmul.f32 %v2779_v26, %v2771_v11  ;;  %2612 = vmatpush3.bf16.msra.mxu1 %v2730_v31  ;;  %v3328_v31 = vld [vmem:[%s3419_s1 + $0x38] sm:$0xff] }
 0xbfe   :  { %2623 = vmatprep.subr.bf16.mxu1 %v2836_v1 }
 0xbff   :  { %2608 = vmatprep.mubr.msk.f32.mxu1 %vm93_vm1, %v3276_v27 }
 0xc00   :  { %2609 = vmatmul.mubr.msk.f32.gmra.mrb[42].mxu1 %vm93_vm1, %v3278_v28 }
 0xc01   :  { %2613 = vmatprep.mubr.msk.bf16.mxu1 %vm2837_vm0, %v2836_v1 }
 0xccf   :  { %v2607_v4 = vpop.f32.mrb[40].mxu1 }
 0xcd0   :  { %v1687_v37 = vpop.f32.mrb[41].mxu1 }
 0xcd1   :  { %v1706_v5 = vpack.c.bf16 %v2607_v4, %v1687_v37  ;;  %v1845_v4 = vrot.slane %v3076_v6, %v1844_v29  ;;  %v2737_v6 = vld [vmem:[%s3423_s5 + $0x58] sm:$0xff]   ;;  %v2739_v29 = vld [vmem:[%s3423_s5 + $0x68] sm:$0xff]  }
 0xcd3   :  { %v2610_v32 = vpop.f32.mrb[42].mxu1  ;;  %2620 = vmatmul.mubr.msk.bf16.vlgmr.msra.gmra.mrb[36].mxu0 %vm468_vm2, %v1706_v5  ;;  %v1851_v5 = vrot.slane %v3328_v31, %v823_v2  ;;  %v2736_v2 = vld [vmem:[%s3423_s5 + $0x50] sm:$0xff]  }
 0xcd4   :  { %v1697_v30 = vpop.f32.mrb[43].mxu1  ;;  %2639 = vmatprep.mubr.msk.bf16.mxu0 %vm2837_vm0, %v2836_v1  ;;  %2632 = vmatpush3.bf16.msra.mxu0 %v2734_v14 }
 0xcd5   :  { %v1707_v33 = vpack.c.bf16 %v2610_v32, %v1697_v30  ;;  %2633 = vmatprep.subr.bf16.mxu0 %v2836_v1 }
 0xcd7   :  { %2614 = vmatmul.mubr.msk.bf16.vlgmr.msra.gmra.mrb[44].mxu1 %vm468_vm2, %v1707_v33 }
 0xcd8   :  { %2627 = vmatprep.mubr.msk.bf16.mxu1 %vm2837_vm0, %v2836_v1  ;;  %2634 = vmatpush3.bf16.msra.mxu0 %v2735_v15 }
 0xcd9   :  { %2635 = vmatprep.subr.bf16.mxu0 %v2836_v1 }
 0xcdc   :  { %2636 = vmatpush3.bf16.msra.mxu0 %v2736_v2 }
 0xcdd   :  { %2637 = vmatprep.subr.bf16.mxu0 %v2836_v1 }
 0xce0   :  { %2638 = vmatpush3.bf16.msra.mxu0 %v2737_v6 }
 0xda6   :  { %v1801_v35 = vpop.f32.mrb[36].mxu0 }
 0xda7   :  { %v2621_v36 = vpop.f32.mrb[37].mxu0 }
 0xda8   :  { %v1804_v38 = vpop.f32.mrb[38].mxu0 }
 0xda9   :  { %v2622_v39 = vpop.f32.mrb[39].mxu0 }
 0xdaa   :  { %v1751_v41 = vpop.f32.mrb[44].mxu1 }
 0xdab   :  { %v1802_v57 = vadd.f32 %v1801_v35, %v1751_v41  ;;  %v2615_v45 = vpop.f32.mrb[45].mxu1 }
 0xdac   :  { %v1754_v55 = vpop.f32.mrb[46].mxu1 }
 0xdad   :  { %v1812_v46 = vadd.f32 %v1811_v40, %v1802_v57  ;;  %v1805_v49 = vadd.f32 %v1804_v38, %v1754_v55  ;;  %v2616_v51 = vpop.f32.mrb[47].mxu1  ;;  %v2320_v57 = vld [vmem:[%s3421_s3 + $0x1] ss:$0 sm:$0xff]  ;;  %s2838_s3 = smov 32  }
 0xdaf   :  { %v1813_v52 = vadd.f32 %v1811_v40, %v1805_v49  ;;  %v1814_v53 = vadd.f32 %v1812_v46, %v3171_v18 }
 0xdb1   :  { %v1816_v54 = vsel %vm93_vm1, %v1814_v53, 0.0  ;;  %v1815_v0 = vadd.f32 %v1813_v52, %v3174_v19  ;;  %v2732_v19 = vld [vmem:[%s3424_s6 + $0x10] sm:$0xff]  }
 0xdb2   :  { %1817 = vadd.xlane.f32.xlu0 %v1816_v54  ;;  %2624 = vmatpush3.bf16.msra.mxu1 %v2732_v19 }
 0xdb3   :  { %v1819_v56 = vsel %vm93_vm1, %v1815_v0, 0.0  ;;  %2625 = vmatprep.subr.bf16.mxu1 %v2836_v1 }
 0xdb4   :  { %1820 = vadd.xlane.f32.xlu1 %v1819_v56  ;;  %v1932_v56 = vrot.slane %v3328_v31, %v858_v42 }
 0xdb6   :  { %2626 = vmatpush3.bf16.msra.mxu1 %v2733_v13 }
 0xdb7   :  { %2643 = vmatprep.subr.bf16.mxu1 %v2836_v1 }
 0xe3f   :  { %v1818_v58 = vpop.xlane.xlu0 %1817 }
 0xe40   :  { %v1822_v60 = vmul.f32 0.03125, %v1818_v58 }
 0xe41   :  { %v1821_v62 = vpop.xlane.xlu1 %1820 }
 0xe42   :  { %v1824_v7 = vsub.f32 %v1814_v53, %v1822_v60  ;;  %v1823_v8 = vmul.f32 0.03125, %v1821_v62 }
 0xe44   :  { %v1825_v9 = vsub.f32 %v1815_v0, %v1823_v8  ;;  %v1826_v10 = vmul.f32 %v1824_v7, %v1824_v7 }
 0xe46   :  { %v1828_v11 = vsel %vm93_vm1, %v1826_v10, 0.0  ;;  %v1827_v12 = vmul.f32 %v1825_v9, %v1825_v9 }
 0xe47   :  { %1829 = vadd.xlane.f32.xlu0 %v1828_v11 }
 0xe48   :  { %v1831_v18 = vsel %vm93_vm1, %v1827_v12, 0.0 }
 0xe49   :  { %1832 = vadd.xlane.f32.xlu1 %v1831_v18 }
 0xed4   :  { %v1830_v16 = vpop.xlane.xlu0 %1829 }
 0xed5   :  { %v1834_v17 = vmul.f32 0.03125, %v1830_v16 }
 0xed6   :  { %v1833_v20 = vpop.xlane.xlu1 %1832 }
 0xed7   :  { %v1836_v22 = vadd.f32 1e-05, %v1834_v17  ;;  %v1835_v25 = vmul.f32 0.03125, %v1833_v20 }
 0xed9   :  { %2780 = vrsqrt.f32 %v1836_v22  ;;  %v1837_v26 = vadd.f32 1e-05, %v1835_v25 }
 0xedb   :  { %2782 = vrsqrt.f32 %v1837_v26  ;;  %v2738_v26 = vld [vmem:[%s3423_s5 + $0x60] sm:$0xff]   ;;  %s2839_s5 = smov [#allocation4]  }
 0xedc   :  { %s2156_s17 = sshll.u32 %s2839_s5, 4  ;;  %s2157_s17 = int_to_ptr.vmem [resolvable:$true] %s2156_s17 }
 0xedd   :  { %s2788_s18 = scalar_lea.vmem %s2157_s17, 512  ;;  %p2793_p1 = scmp.lt.s32.totalorder %s2157_s17, %s2157_s17 }
 0xede   :  { %p2789_p0 = scmp.ne.s32.totalorder %s2157_s17, %s2788_s18  ;;  %p2794_p2 = scmp.lt.s32.totalorder %s2788_s18, %s2788_s18 }
 0xee0   :  { %p2795_p3 = por %p2794_p2, %p2793_p1 }
 0xee2   :  { %p2796_p4 = pnand %p2795_p3, %p2789_p0 }
 0xee3   :  { %v2781_v37 = vpop.eup %2780 }
 0xee4   :  { %v1840_v32 = vmul.f32 %v2781_v37, %v1824_v7 }
 0xee5   :  { %v2783_v30 = vpop.eup %2782 }
 0xee6   :  { %v1846_v33 = vmul.f32 %v1845_v4, %v1840_v32  ;;  %v1841_v34 = vmul.f32 %v2783_v30, %v1825_v9 }
 0xee8   :  { %v1847_v35 = vmul.f32 %v1845_v4, %v1841_v34  ;;  %v1852_v36 = vadd.f32 %v1851_v5, %v1846_v33 }
 0xeea   :  { %v1853_v38 = vadd.f32 %v1851_v5, %v1847_v35  ;;  %v1854_v39 = vmul.f32 %v1852_v36, %v3114_v59  ;;  %v2032_v35 = vrot.slane %v3328_v31, %v864_v43 }
 0xeec   :  { %v1855_v40 = vmul.f32 %v1853_v38, %v3119_v61 }
 0xeee   :  { %v1856_v41 = vpack.c.bf16 %v1855_v40, %v1854_v39 }
 0xef0   :  { %2628 = vmatmul.mubr.msk.bf16.vlgmr.msra.gmra.mrb[48].mxu1 %vm93_vm1, %v1856_v41 }
 0xef1   :  { %2647 = vmatprep.mubr.msk.bf16.mxu1 %vm2837_vm0, %v2836_v1  ;;  %2644 = vmatpush3.bf16.msra.mxu1 %v2738_v26 }
 0xef2   :  { %2645 = vmatprep.subr.bf16.mxu1 %v2836_v1 }
 0xef5   :  { %2646 = vmatpush3.bf16.msra.mxu1 %v2739_v29 }
 0xfc3   :  { %v1919_v45 = vpop.f32.mrb[48].mxu1 }
 0xfc4   :  { %v1920_v55 = vadd.f32 %v2320_v57, %v1919_v45  ;;  %v2629_v46 = vpop.f32.mrb[49].mxu1 }
 0xfc5   :  { %v1922_v49 = vpop.f32.mrb[50].mxu1 }
 0xfc6   :  { %v1923_v51 = vadd.f32 %v2320_v57, %v1922_v49  ;;  %v2630_v52 = vpop.f32.mrb[51].mxu1  ;;  %v1926_v53 = vmax.f32 %v1920_v55, 0.0 }
 0xfc8   :  { %v1927_v54 = vmax.f32 %v1923_v51, 0.0 }
 0xfca   :  { %v1928_v0 = vpack.c.bf16 %v1927_v54, %v1926_v53 }
 0xfcc   :  { %2640 = vmatmul.mubr.msk.bf16.vlgmr.msra.gmra.mrb[40].mxu0 %vm969_vm4, %v1928_v0 }
0x109f   :  { %v1994_v58 = vpop.f32.mrb[40].mxu0 }
0x10a0   :  { %v1995_v60 = vadd.f32 %v1994_v58, %v1932_v56  ;;  %v2641_v62 = vpop.f32.mrb[41].mxu0 }
0x10a1   :  { %v1997_v7 = vpop.f32.mrb[42].mxu0 }
0x10a2   :  { %v1998_v8 = vadd.f32 %v1997_v7, %v1932_v56  ;;  %v2642_v9 = vpop.f32.mrb[43].mxu0  ;;  %v2001_v10 = vadd.f32 %v1995_v60, %v1854_v39 }
0x10a4   :  { %v2003_v11 = vsel %vm93_vm1, %v2001_v10, 0.0  ;;  %v2002_v12 = vadd.f32 %v1998_v8, %v1855_v40 }
0x10a5   :  { %2004 = vadd.xlane.f32.xlu0 %v2003_v11 }
0x10a6   :  { %v2006_v18 = vsel %vm93_vm1, %v2002_v12, 0.0 }
0x10a7   :  { %2007 = vadd.xlane.f32.xlu1 %v2006_v18 }
0x1132   :  { %v2005_v19 = vpop.xlane.xlu0 %2004 }
0x1133   :  { %v2009_v13 = vmul.f32 0.03125, %v2005_v19 }
0x1134   :  { %v2008_v14 = vpop.xlane.xlu1 %2007 }
0x1135   :  { %v2011_v15 = vsub.f32 %v2001_v10, %v2009_v13  ;;  %v2010_v16 = vmul.f32 0.03125, %v2008_v14 }
0x1137   :  { %v2012_v42 = vsub.f32 %v2002_v12, %v2010_v16  ;;  %v2013_v17 = vmul.f32 %v2011_v15, %v2011_v15 }
0x1139   :  { %v2015_v20 = vsel %vm93_vm1, %v2013_v17, 0.0  ;;  %v2014_v22 = vmul.f32 %v2012_v42, %v2012_v42 }
0x113a   :  { %2016 = vadd.xlane.f32.xlu0 %v2015_v20 }
0x113b   :  { %v2018_v25 = vsel %vm93_vm1, %v2014_v22, 0.0 }
0x113c   :  { %2019 = vadd.xlane.f32.xlu1 %v2018_v25 }
0x114d   :  { %2123 = vrot.lane.b32.xlu1 %v3270_v24, %s2838_s3 }
0x1150   :  { %2121 = vrot.lane.b32.xlu0 %v3268_v23, %s2838_s3 }
0x1151   :  { %2125 = vrot.lane.b32.xlu1 %v3276_v27, %s2838_s3 }
0x1155   :  { %2127 = vrot.lane.b32.xlu1 %v3278_v28, %s2838_s3 }
0x11c7   :  { %v2017_v4 = vpop.xlane.xlu0 %2016 }
0x11c8   :  { %v2021_v24 = vmul.f32 0.03125, %v2017_v4 }
0x11c9   :  { %v2020_v37 = vpop.xlane.xlu1 %2019 }
0x11ca   :  { %v2023_v23 = vadd.f32 1e-05, %v2021_v24  ;;  %v2022_v5 = vmul.f32 0.03125, %v2020_v37 }
0x11cb   :  { %v2122_v27 = vpop.permute.xlu0 %2121 }
0x11cc   :  { %2784 = vrsqrt.f32 %v2023_v23  ;;  %v2024_v28 = vadd.f32 1e-05, %v2022_v5  ;;  %v2133_v32 = vsel %vm93_vm1, %v3038_v44, %v2122_v27 }
0x11cd   :  { %2137 = vst.msk [vmem:[#allocation4] sm:$0xff] %vm969_vm4, %v2133_v32  ;;  %v2124_v30 = vpop.permute.xlu1 %2123 }
0x11ce   :  { %2786 = vrsqrt.f32 %v2024_v28  ;;  %v2134_v33 = vsel %vm93_vm1, %v3044_v48, %v2124_v30  ;;  %v2038_v48 = vrot.slane %v3328_v31, %v943_v21 }
0x11cf   :  { %2138 = vst.msk [vmem:[#allocation4 + $0x8] sm:$0xff] %vm969_vm4, %v2134_v33 }
0x11d1   :  { %v2126_v1 = vpop.permute.xlu1 %2125 }
0x11d2   :  { %v2135_v34 = vsel %vm93_vm1, %v3042_v47, %v2126_v1 }
0x11d3   :  { %2139 = vst.msk [vmem:[#allocation4 + $0x10] sm:$0xff] %vm969_vm4, %v2135_v34 }
0x11d5   :  { %v2128_v44 = vpop.permute.xlu1 %2127 }
0x11d6   :  { %v2785_v36 = vpop.eup %2784  ;;  %v2136_v38 = vsel %vm93_vm1, %v3050_v50, %v2128_v44 }
0x11d7   :  { %v2027_v39 = vmul.f32 %v2785_v36, %v2011_v15  ;;  %2140 = vst.msk [vmem:[#allocation4 + $0x18] sm:$0xff] %vm969_vm4, %v2136_v38 }
0x11d8   :  { %v2787_v40 = vpop.eup %2786 }
0x11d9   :  { %v2033_v47 = vmul.f32 %v2032_v35, %v2027_v39  ;;  %v2028_v41 = vmul.f32 %v2787_v40, %v2012_v42 }
0x11db   :  { %v2039_v2 = vadd.f32 %v2038_v48, %v2033_v47  ;;  %v2034_v6 = vmul.f32 %v2032_v35, %v2028_v41 }
0x11dd   :  { %v2041_v57 = vmul.f32 %v2039_v2, %v3114_v59  ;;  %v2040_v43 = vadd.f32 %v2038_v48, %v2034_v6 }
0x11df   :  { %v2043_v45 = vsel %vm93_vm1, %v2041_v57, -inf  ;;  %v2042_v55 = vmul.f32 %v2040_v43, %v3119_v61 }
0x11e0   :  { %v2044_v50 = vrot.slane %v2043_v45, 4 }
0x11e1   :  { %v2050_v46 = vsel %vm93_vm1, %v2042_v55, -inf }
0x11e2   :  { %v2051_v49 = vrot.slane %v2050_v46, 4  ;;  %v2045_v21 = vmax.f32 %v2043_v45, %v2044_v50 }
0x11e4   :  { %v2046_v51 = vrot.slane %v2045_v21, 2  ;;  %v2052_v52 = vmax.f32 %v2050_v46, %v2051_v49 }
0x11e6   :  { %v2047_v53 = vmax.f32 %v2045_v21, %v2046_v51  ;;  %v2053_v54 = vrot.slane %v2052_v52, 2 }
0x11e8   :  { %v2048_v0 = vrot.slane %v2047_v53, 1  ;;  %v2054_v56 = vmax.f32 %v2052_v52, %v2053_v54 }
0x11ea   :  { %v2055_v58 = vrot.slane %v2054_v56, 1  ;;  %v2049_v60 = vmax.f32 %v2047_v53, %v2048_v0 }
0x11ec   :  { %v2056_v59 = vmax.f32 %v2054_v56, %v2055_v58 }
0x11ee   :  { %v2058_v62 = vsel %vm2057_vm5, %v2049_v60, %v2056_v59 }
0x11ef   :  { %v2059_v7 = vpack.c.bf16 %v2058_v62, %v2058_v62 }
0x11f1   :  { %2648 = vmatmul.mubr.msk.bf16.vlgmr.msra.gmra.mrb[52].mxu1 %vm93_vm1, %v2059_v7 }
0x11f2   :  { %2799 = shalt.err (!%p2796_p4)
}
0x11f3   :  { %s2800_s19 = scalar_lea.hbm %s3426_s8, 512 }
0x11f4   :  { %p2801_p5 = scmp.ne.s32.totalorder %s3426_s8, %s2800_s19  ;;  %p2804_p6 = scmp.lt.u32.totalorder %s2800_s19, %s3426_s8 }
0x11f6   :  { %p2806_p7 = pnand %p2804_p6, %p2801_p5 }
0x11f8   :  { %2809 = shalt.err (!%p2806_p7)
}
0x11f9   :  { %s2840_s24 = smov 128   ;;  %s2841_s25 = smov 8   ;;  %v2063_v61 = vrot.slane %v3328_v31, %v1044_v3  ;;  %vm2119_vm6 = vcmask 254976  }
0x11fa   :  { %2162 = dma.vmem_to_hbm [thread:$0]  %s2157_s17, 512, %s3426_s8, [#allocation5], %s2840_s24, %s2840_s24, %s2841_s25  }
0x11fb   :  { %s2842_s28 = smov [#allocation2]  }
0x11fc   :  { %s2147_s29 = sshll.u32 %s2842_s28, 4  ;;  %s2148_s29 = int_to_ptr.vmem [resolvable:$true] %s2147_s29 }
0x11fd   :  { %s2810_s6 = scalar_lea.vmem %s2148_s29, 32  ;;  %p2815_p9 = scmp.lt.s32.totalorder %s2148_s29, %s2148_s29 }
0x11fe   :  { %p2811_p8 = scmp.ne.s32.totalorder %s2148_s29, %s2810_s6  ;;  %p2816_p10 = scmp.lt.s32.totalorder %s2810_s6, %s2810_s6 }
0x1200   :  { %p2817_p11 = por %p2816_p10, %p2815_p9 }
0x1202   :  { %p2818_p12 = pnand %p2817_p11, %p2811_p8 }
0x12c4   :  { %v2113_v8 = vpop.f32.mrb[52].mxu1 }
0x12c5   :  { %v2114_v9 = vadd.f32 %v2113_v8, %v2063_v61  ;;  %v2649_v10 = vpop.f32.mrb[53].mxu1 }
0x12c6   :  { %v2116_v11 = vpop.f32.mrb[54].mxu1 }
0x12c7   :  { %v2650_v12 = vpop.f32.mrb[55].mxu1  ;;  %2120 = vst.msk [vmem:[#allocation2] sm:$0x3] %vm2119_vm6, %v2114_v9 }
0x12c8   :  { %2821 = shalt.err (!%p2818_p12)
}
0x12c9   :  { %s2822_s1 = scalar_lea.hbm %s3425_s7, 32 }
0x12ca   :  { %p2823_p13 = scmp.ne.s32.totalorder %s3425_s7, %s2822_s1  ;;  %p2826_p0 = scmp.lt.u32.totalorder %s2822_s1, %s3425_s7 }
0x12cc   :  { %p2828_p1 = pnand %p2826_p0, %p2823_p13 }
0x12ce   :  { %2831 = shalt.err (!%p2828_p1)
}
0x12cf   :  { %2150 = dma.vmem_to_hbm [thread:$0]  %s2148_s29, 32, %s3425_s7, [#allocation3]  }
0x12d0   :  { %2832 = dma.done.wait [#allocation3], 32  }
0x12d1   :  { %2833 = vsyncadd [#allocation3], 4294967264 }
0x12d2   :  { %2834 = dma.done.wait [#allocation5], 512  }
0x12d3   :  { %2835 = vsyncadd [#allocation5], 4294966784 }
0x12d4   :  { %2169 = vsyncpa [#allocation3], 1 }
0x12d5   :  { %2170 = vsyncpa [#allocation5], 1 }

</bundles_post_ra>
